<compile_context>
chip_gen: v6e
topology: v6e:2x2x1
jax: 0.10.0
libtpu: 0.0.40
codegen_flags: <defaults>
</compile_context>

<pallas_src>
import functools

import jax
import jax.numpy as jnp
from jax.experimental import pallas as pl
from jax.experimental.pallas import tpu as pltpu


def _round_up(x, m):
    return (x + m - 1) // m * m


def _convlstm_kernel(x_ref, h_ref, c_ref, wx_ref, wh_ref, b_ref, out_ref):
    """One tile of pixel rows.

    x_ref  : (tm, Cin)      input channels per pixel
    h_ref  : (tm, Ch)       current hidden state
    c_ref  : (tm, Ch)       current cell state
    wx_ref : (Cin, 4*Ch)    1x1 conv weight, input part
    wh_ref : (Ch, 4*Ch)     1x1 conv weight, hidden part
    b_ref  : (1, 4*Ch)      conv bias
    out_ref: (tm, 2*Ch)     fused [h_next | c_next]
    """
    ch = c_ref.shape[-1]

    # 1x1 conv == channel matmul on the MXU, f32 accumulate.  Splitting the
    # weight avoids materializing concat([x, h]) in HBM in the wrapper.
    acc = jnp.dot(x_ref[...], wx_ref[...], preferred_element_type=jnp.float32)
    acc = acc + jnp.dot(h_ref[...], wh_ref[...],
                        preferred_element_type=jnp.float32)
    acc = acc + b_ref[...]
    acc = jnp.maximum(acc, 0.0)  # F.relu(combined_conv)

    # Single full-width transcendental pass on the EUP:
    #   i, f, o = sigmoid(x) = 0.5 * (1 + tanh(x / 2));   g = tanh(x)
    # tanh-only keeps the epilogue off the VALU (no divides) and runs at full
    # 4*Ch lane width instead of four Ch-wide slices.
    lane = jax.lax.broadcasted_iota(jnp.int32, acc.shape, 1)
    is_g = lane >= 3 * ch
    t = jnp.tanh(jnp.where(is_g, acc, 0.5 * acc))
    act = jnp.where(is_g, t, 0.5 * (t + 1.0))

    # Gate extraction: cheap XLU lane rotates; the subsequent VPU math is tiny
    # compared to the HBM traffic this kernel is bound by.
    i = act[:, 0 * ch:1 * ch]
    f = act[:, 1 * ch:2 * ch]
    o = act[:, 2 * ch:3 * ch]
    g = act[:, 3 * ch:4 * ch]

    c_cur = c_ref[...].astype(jnp.float32)
    c_next = f * c_cur + i * g
    h_next = o * jnp.tanh(c_next)

    # One fused, lane-denser store (2*Ch lanes) instead of two Ch-wide masked
    # store streams.
    out_ref[...] = jnp.concatenate([h_next, c_next], axis=-1).astype(out_ref.dtype)


def prepare_weights(weight, bias, input_channels):
    """PyTorch Conv2d (4*Ch, Cin+Ch, 1, 1) weight -> (Wx, Wh, b) matrices."""
    w = weight[:, :, 0, 0]  # (4*Ch, Cin+Ch)
    wx = jnp.transpose(w[:, :input_channels]).astype(jnp.float32)  # (Cin, 4*Ch)
    wh = jnp.transpose(w[:, input_channels:]).astype(jnp.float32)  # (Ch, 4*Ch)
    b = bias.reshape(1, -1).astype(jnp.float32)                    # (1, 4*Ch)
    return wx, wh, b


@functools.partial(jax.jit, static_argnames=("tm",))
def conv_lstm_cell_rows(x_rows, h_rows, c_rows, wx, wh, b, *, tm=None):
    """ConvLSTMCell step on channels-last pixel rows.

    x_rows : (M, Cin), h_rows/c_rows : (M, Ch), wx : (Cin, 4*Ch),
    wh : (Ch, 4*Ch), b : (1, 4*Ch).  Returns (h_next_rows, c_next_rows).
    Use this entry point inside a recurrence so h/c stay in rows layout.
    """
    M, Cin = x_rows.shape
    Ch = h_rows.shape[1]
    N = 4 * Ch

    if tm is None:
        # Big tiles amortize the ~0.35us per-grid-step overhead; keep >= 2
        # grid steps when possible so the "parallel" axis can shard across
        # v7x's two TensorCores.  Per-tile VMEM (double-buffered x/h/c/out +
        # resident weights) stays at a few MiB even at tm=1024, well inside
        # v7x's 64 MiB physical VMEM.
        tm = min(1024, max(256, _round_up(pl.cdiv(M, 2), 256)))
    tm = min(tm, _round_up(M, 8))

    M_pad = _round_up(M, tm)
    if M_pad != M:
        pad = M_pad - M
        x_rows = jnp.pad(x_rows, ((0, pad), (0, 0)))
        h_rows = jnp.pad(h_rows, ((0, pad), (0, 0)))
        c_rows = jnp.pad(c_rows, ((0, pad), (0, 0)))

    grid = (M_pad // tm,)
    out = pl.pallas_call(
        _convlstm_kernel,
        out_shape=jax.ShapeDtypeStruct((M_pad, 2 * Ch), x_rows.dtype),
        grid_spec=pltpu.PrefetchScalarGridSpec(
            num_scalar_prefetch=0,
            grid=grid,
            in_specs=[
                pl.BlockSpec((tm, Cin), lambda i: (i, 0)),   # x rows
                pl.BlockSpec((tm, Ch), lambda i: (i, 0)),    # h rows
                pl.BlockSpec((tm, Ch), lambda i: (i, 0)),    # c rows
                pl.BlockSpec((Cin, N), lambda i: (0, 0)),    # Wx (resident)
                pl.BlockSpec((Ch, N), lambda i: (0, 0)),     # Wh (resident)
                pl.BlockSpec((1, N), lambda i: (0, 0)),      # bias (resident)
            ],
            out_specs=pl.BlockSpec((tm, 2 * Ch), lambda i: (i, 0)),
        ),
        compiler_params=pltpu.CompilerParams(
            dimension_semantics=("parallel",),
        ),
    )(x_rows, h_rows, c_rows, wx, wh, b)

    h_next = out[:M, :Ch]
    c_next = out[:M, Ch:]
    return h_next, c_next


@functools.partial(jax.jit, static_argnames=("tm",))
def conv_lstm_cell(x, h_cur, c_cur, weight, bias, *, tm=None):
    """ConvLSTMCell.forward for kernel_size == 1, PyTorch NCHW layout.

    x      : (B, Cin, H, W)
    h_cur  : (B, Ch, H, W)
    c_cur  : (B, Ch, H, W)
    weight : (4*Ch, Cin+Ch, 1, 1)   PyTorch Conv2d weight layout
    bias   : (4*Ch,)
    returns (h_next, c_next) both (B, Ch, H, W)
    """
    if weight.shape[2] != 1 or weight.shape[3] != 1:
        raise NotImplementedError("only kernel_size == 1 is implemented")

    B, Cin, H, W = x.shape
    Ch = h_cur.shape[1]
    M = B * H * W

    def to_rows(t):
        return jnp.transpose(t, (0, 2, 3, 1)).reshape(M, t.shape[1])

    x_rows = to_rows(x)
    h_rows = to_rows(h_cur)
    c_rows = to_rows(c_cur)
    wx, wh, b = prepare_weights(weight, bias, Cin)

    h_next_rows, c_next_rows = conv_lstm_cell_rows(
        x_rows, h_rows, c_rows, wx, wh, b, tm=tm)

    def to_nchw(rows):
        return jnp.transpose(rows.reshape(B, H, W, Ch), (0, 3, 1, 2))

    return to_nchw(h_next_rows), to_nchw(c_next_rows)


def conv_lstm_cell_ref(x, h_cur, c_cur, weight, bias):
    """Pure-JAX reference mirroring the PyTorch forward exactly."""
    combined = jnp.concatenate([x, h_cur], axis=1)  # (B, Cin+Ch, H, W)
    w = weight[:, :, 0, 0]  # (4*Ch, Cin+Ch)
    conv = jnp.einsum("bchw,oc->bohw", combined, w) + bias[None, :, None, None]
    conv = jax.nn.relu(conv)
    cc_i, cc_f, cc_o, cc_g = jnp.split(conv, 4, axis=1)
    i = jax.nn.sigmoid(cc_i)
    f = jax.nn.sigmoid(cc_f)
    o = jax.nn.sigmoid(cc_o)
    g = jnp.tanh(cc_g)
    c_next = f * c_cur + i * g
    h_next = o * jnp.tanh(c_next)
    return h_next, c_next


if __name__ == "__main__":
    # Small shapes consistent with the module's forward:
    # batch=2, input_channels=4, hidden_channels=32, spatial 16x16, ks=1.
    B, Cin, Ch, H, W = 2, 4, 32, 16, 16
    seq = 3
    kernel_size = 1

    key = jax.random.PRNGKey(0)
    kx, kh, kc, kw, kb = jax.random.split(key, 5)

    xs = jax.random.normal(kx, (seq, B, Cin, H, W), dtype=jnp.float32)
    h0 = jax.random.normal(kh, (B, Ch, H, W), dtype=jnp.float32)
    c0 = jax.random.normal(kc, (B, Ch, H, W), dtype=jnp.float32)

    fan_in = (Cin + Ch) * kernel_size * kernel_size
    bound = 1.0 / (fan_in ** 0.5)
    weight = jax.random.uniform(
        kw, (4 * Ch, Cin + Ch, kernel_size, kernel_size),
        minval=-bound, maxval=bound, dtype=jnp.float32)
    bias = jax.random.uniform(
        kb, (4 * Ch,), minval=-bound, maxval=bound, dtype=jnp.float32)

    # --- single step through the PyTorch-compatible NCHW wrapper ---
    h1, c1 = conv_lstm_cell(xs[0], h0, c0, weight, bias)
    jax.block_until_ready((h1, c1))
    h1_ref, c1_ref = conv_lstm_cell_ref(xs[0], h0, c0, weight, bias)
    assert h1.shape == (B, Ch, H, W) and c1.shape == (B, Ch, H, W)
    assert jnp.allclose(h1, h1_ref, atol=1e-4, rtol=1e-4)
    assert jnp.allclose(c1, c1_ref, atol=1e-4, rtol=1e-4)

    # --- short recurrence kept in rows layout (NCHW <-> rows only once) ---
    M = B * H * W
    to_rows = lambda t: jnp.transpose(t, (0, 2, 3, 1)).reshape(M, t.shape[1])
    to_nchw = lambda r: jnp.transpose(r.reshape(B, H, W, Ch), (0, 3, 1, 2))

    wx, wh, bmat = prepare_weights(weight, bias, Cin)
    h_rows, c_rows = to_rows(h0), to_rows(c0)
    h_ref_t, c_ref_t = h0, c0
    for t in range(seq):
        h_rows, c_rows = conv_lstm_cell_rows(
            to_rows(xs[t]), h_rows, c_rows, wx, wh, bmat)
        h_ref_t, c_ref_t = conv_lstm_cell_ref(xs[t], h_ref_t, c_ref_t,
                                              weight, bias)
    jax.block_until_ready((h_rows, c_rows))
    assert jnp.allclose(to_nchw(h_rows), h_ref_t, atol=1e-4, rtol=1e-4)
    assert jnp.allclose(to_nchw(c_rows), c_ref_t, atol=1e-4, rtol=1e-4)

    print("KERNEL_OK")
</pallas_src>

<mosaic_0001>
module attributes {stable_mosaic.version = 11 : i64} {
  func.func @_convlstm_kernel(%arg0: i32, %arg1: memref<256x4xf32, #tpu.memory_space<vmem>>, %arg2: memref<256x32xf32, #tpu.memory_space<vmem>>, %arg3: memref<256x32xf32, #tpu.memory_space<vmem>>, %arg4: memref<4x128xf32, #tpu.memory_space<vmem>>, %arg5: memref<32x128xf32, #tpu.memory_space<vmem>>, %arg6: memref<1x128xf32, #tpu.memory_space<vmem>>, %arg7: memref<256x64xf32, #tpu.memory_space<vmem>>) attributes {dimension_semantics = [#tpu.dimension_semantics<parallel>], iteration_bounds = array<i64: 2>, scalar_prefetch = 0 : i64, scratch_operands = 0 : i64, tpu.core_type = #tpu.core_type<tc>, window_params = [{transform_indices = @transform_0, window_bounds = array<i64: 256, 4>}, {transform_indices = @transform_1, window_bounds = array<i64: 256, 32>}, {transform_indices = @transform_2, window_bounds = array<i64: 256, 32>}, {pipeline_mode = #tpu.pipeline_mode<synchronous>, transform_indices = @transform_3, window_bounds = array<i64: 4, 128>}, {pipeline_mode = #tpu.pipeline_mode<synchronous>, transform_indices = @transform_4, window_bounds = array<i64: 32, 128>}, {pipeline_mode = #tpu.pipeline_mode<synchronous>, transform_indices = @transform_5, window_bounds = array<i64: 1, 128>}, {transform_indices = @transform_6, window_bounds = array<i64: 256, 64>}]} {
    %c0 = arith.constant 0 : index
    %c0_0 = arith.constant 0 : index
    %0 = vector.load %arg1[%c0, %c0_0] : memref<256x4xf32, #tpu.memory_space<vmem>>, vector<256x4xf32>
    %c0_1 = arith.constant 0 : index
    %c0_2 = arith.constant 0 : index
    %1 = vector.load %arg4[%c0_1, %c0_2] : memref<4x128xf32, #tpu.memory_space<vmem>>, vector<4x128xf32>
    %cst = arith.constant dense<0.000000e+00> : vector<256x128xf32>
    %2 = tpu.matmul %0, %1, %cst {dimension_numbers = #tpu.dot_dimension_numbers<[1], [0], [0], [1], [0, 0, 1, 1], [], []>} : vector<256x4xf32>, vector<4x128xf32>, vector<256x128xf32> -> vector<256x128xf32>
    %c0_3 = arith.constant 0 : index
    %c0_4 = arith.constant 0 : index
    %3 = vector.load %arg2[%c0_3, %c0_4] : memref<256x32xf32, #tpu.memory_space<vmem>>, vector<256x32xf32>
    %c0_5 = arith.constant 0 : index
    %c0_6 = arith.constant 0 : index
    %4 = vector.load %arg5[%c0_5, %c0_6] : memref<32x128xf32, #tpu.memory_space<vmem>>, vector<32x128xf32>
    %cst_7 = arith.constant dense<0.000000e+00> : vector<256x128xf32>
    %5 = tpu.matmul %3, %4, %cst_7 {dimension_numbers = #tpu.dot_dimension_numbers<[1], [0], [0], [1], [0, 0, 1, 1], [], []>} : vector<256x32xf32>, vector<32x128xf32>, vector<256x128xf32> -> vector<256x128xf32>
    %6 = arith.addf %2, %5 : vector<256x128xf32>
    %c0_8 = arith.constant 0 : index
    %c0_9 = arith.constant 0 : index
    %7 = vector.load %arg6[%c0_8, %c0_9] : memref<1x128xf32, #tpu.memory_space<vmem>>, vector<1x128xf32>
    %8 = vector.broadcast %7 : vector<1x128xf32> to vector<256x128xf32>
    %9 = arith.addf %6, %8 : vector<256x128xf32>
    %cst_10 = arith.constant 0.000000e+00 : f32
    %10 = vector.broadcast %cst_10 : f32 to vector<256x128xf32>
    %11 = arith.maximumf %9, %10 : vector<256x128xf32>
    %12 = tpu.iota {dimensions = array<i32: 1>} : vector<256x128xi32>
    %c96_i32 = arith.constant 96 : i32
    %13 = vector.broadcast %c96_i32 : i32 to vector<256x128xi32>
    %14 = arith.cmpi sge, %12, %13 : vector<256x128xi32>
    %cst_11 = arith.constant 5.000000e-01 : f32
    %15 = vector.broadcast %cst_11 : f32 to vector<256x128xf32>
    %16 = arith.mulf %15, %11 : vector<256x128xf32>
    %17 = arith.select %14, %11, %16 : vector<256x128xi1>, vector<256x128xf32>
    %18 = math.tanh %17 : vector<256x128xf32>
    %cst_12 = arith.constant 1.000000e+00 : f32
    %19 = vector.broadcast %cst_12 : f32 to vector<256x128xf32>
    %20 = arith.addf %18, %19 : vector<256x128xf32>
    %cst_13 = arith.constant 5.000000e-01 : f32
    %21 = vector.broadcast %cst_13 : f32 to vector<256x128xf32>
    %22 = arith.mulf %21, %20 : vector<256x128xf32>
    %23 = arith.select %14, %18, %22 : vector<256x128xi1>, vector<256x128xf32>
    %24 = vector.extract_strided_slice %23 {offsets = [0, 0], sizes = [256, 32], strides = [1, 1]} : vector<256x128xf32> to vector<256x32xf32>
    %25 = vector.extract_strided_slice %23 {offsets = [0, 32], sizes = [256, 32], strides = [1, 1]} : vector<256x128xf32> to vector<256x32xf32>
    %26 = vector.extract_strided_slice %23 {offsets = [0, 64], sizes = [256, 32], strides = [1, 1]} : vector<256x128xf32> to vector<256x32xf32>
    %27 = vector.extract_strided_slice %23 {offsets = [0, 96], sizes = [256, 32], strides = [1, 1]} : vector<256x128xf32> to vector<256x32xf32>
    %c0_14 = arith.constant 0 : index
    %c0_15 = arith.constant 0 : index
    %28 = vector.load %arg3[%c0_14, %c0_15] : memref<256x32xf32, #tpu.memory_space<vmem>>, vector<256x32xf32>
    %29 = arith.mulf %25, %28 : vector<256x32xf32>
    %30 = arith.mulf %24, %27 : vector<256x32xf32>
    %31 = arith.addf %29, %30 : vector<256x32xf32>
    %32 = math.tanh %31 : vector<256x32xf32>
    %33 = arith.mulf %26, %32 : vector<256x32xf32>
    %34 = tpu.concatenate %33, %31 in 1 : vector<256x32xf32>, vector<256x32xf32> -> vector<256x64xf32>
    %c0_16 = arith.constant 0 : index
    %c0_17 = arith.constant 0 : index
    %35 = vector.load %arg7[%c0_16, %c0_17] : memref<256x64xf32, #tpu.memory_space<vmem>>, vector<256x64xf32>
    tpu.vector_store %arg7[%c0_16, %c0_17], %34 {strides = array<i32>} : memref<256x64xf32, #tpu.memory_space<vmem>>, vector<256x64xf32>,
    return
  }
  func.func @transform_0(%arg0: i32) -> (i32, i32) {
    %c0_i32 = arith.constant 0 : i32
    %c0_i32_0 = arith.constant 0 : i32
    return %arg0, %c0_i32 : i32, i32
  }
  func.func @transform_1(%arg0: i32) -> (i32, i32) {
    %c0_i32 = arith.constant 0 : i32
    %c0_i32_0 = arith.constant 0 : i32
    return %arg0, %c0_i32 : i32, i32
  }
  func.func @transform_2(%arg0: i32) -> (i32, i32) {
    %c0_i32 = arith.constant 0 : i32
    %c0_i32_0 = arith.constant 0 : i32
    return %arg0, %c0_i32 : i32, i32
  }
  func.func @transform_3(%arg0: i32) -> (i32, i32) {
    %c0_i32 = arith.constant 0 : i32
    %c0_i32_0 = arith.constant 0 : i32
    %c0_i32_1 = arith.constant 0 : i32
    return %c0_i32, %c0_i32_0 : i32, i32
  }
  func.func @transform_4(%arg0: i32) -> (i32, i32) {
    %c0_i32 = arith.constant 0 : i32
    %c0_i32_0 = arith.constant 0 : i32
    %c0_i32_1 = arith.constant 0 : i32
    return %c0_i32, %c0_i32_0 : i32, i32
  }
  func.func @transform_5(%arg0: i32) -> (i32, i32) {
    %c0_i32 = arith.constant 0 : i32
    %c0_i32_0 = arith.constant 0 : i32
    %c0_i32_1 = arith.constant 0 : i32
    return %c0_i32, %c0_i32_0 : i32, i32
  }
  func.func @transform_6(%arg0: i32) -> (i32, i32) {
    %c0_i32 = arith.constant 0 : i32
    %c0_i32_0 = arith.constant 0 : i32
    return %arg0, %c0_i32 : i32, i32
  }
}

</mosaic_0001>

<bundles_post_ra>
// kernel: conv_lstm_cell_rows.1
= control target key start
LH: loop header
LB: loop body
LE: loop exit
PB: predicated region body
PF: predicated region fallthrough
CT: control target
= control target key end

     0   :  { %s2698_s21 = smov 0   ;;  %s3762_s0 = inlined_call_operand.vmem [shape: f32[512,4], index: 0, kind: input, shape index: {}]   ;;  %s3763_s1 = inlined_call_operand.vmem [shape: f32[512,32], index: 1, kind: input, shape index: {}]   ;;  %s3764_s2 = inlined_call_operand.vmem [shape: f32[512,32], index: 2, kind: input, shape index: {}]   ;;  %s3765_s3 = inlined_call_operand.vmem [shape: f32[4,128], index: 3, kind: input, shape index: {}]   ;;  %s3766_s4 = inlined_call_operand.vmem [shape: f32[32,128], index: 4, kind: input, shape index: {}]   ;;  %s3767_s5 = inlined_call_operand.vmem [shape: f32[1,128], index: 5, kind: input, shape index: {}]   ;;  %s3768_s6 = inlined_call_operand.vmem [shape: f32[512,64], index: 6, kind: output, shape index: {}]  }
   0x1 LB: > { %s2259_s22 = sadd.s32 4294967295, %s2659_s21   ;;  %p2263_p0 = scmp.ge.s32.totalorder %s2659_s21, 1  ;;  %s2659_s21 = sphi %s2698_s21, %s16_s21  }
   0x2   : > { %p235_p1 = scmp.lt.s32.totalorder %s2659_s21, 3 }
   0x4   : > { %p236_p2 = pnand %p2263_p0, %p235_p1 }
   0x6   : > { %239 = sbr.rel (%p236_p2) target bundleno = 793 (0x319), region = 44 }
   0xb   : > { %v367_v0 = vld [vmem:[%s3766_s4 + $0x18] sm:$0xff]  ;;  %v366_v1 = vld [vmem:[%s3766_s4 + $0x10] sm:$0xff]  ;;  %vm787_vm0 = vcmask 1043456   ;;  %s2264_s27 = sshll.u32 %s2259_s22, 5  ;;  %v331_v2 = vld [vmem:[%s3765_s3] sm:$0xf] }
   0xc   : > { %2409 = vmatprep.subr.mxu0 %v367_v0  ;;  %p276_p3 = scmp.lt.s32.totalorder %s2264_s27, 63  ;;  %v365_v3 = vld [vmem:[%s3766_s4 + $0x8] sm:$0xff]  ;;  %2465 = vmatprep.subr.msk.mxu1 %vm787_vm0, %v331_v2  ;;  %v364_v4 = vld [vmem:[%s3766_s4] sm:$0xff]  ;;  %vm368_vm1 = vcmask 261120   ;;  %vm690_vm2 = vcmask 31744   ;;  %s2661_s20 = smov 32  }
   0xd   : > { %2410 = vmatpush3.msra.mxu0 %v367_v0  ;;  %2466 = vmatpush3.msk.msra.mxu1 %vm787_vm0, %v331_v2  ;;  %s2662_s24 = smov 64   ;;  %vm2146_vm4 = vcmask 523264  }
   0xe   : > { %2411 = vmatprep.subr.mxu0 %v366_v1  ;;  %s3820_s27 = smov (!%p276_p3, %s2264_s27), 63 }
   0xf   : > { %2412 = vmatpush3.msra.mxu0 %v366_v1  ;;  %s2721_s10 = sshll.u32 %s3820_s27, 3 }
  0x10   : > { %2413 = vmatprep.subr.mxu0 %v365_v3  ;;  %s2727_s13 = scalar_lea.vmem %s3763_s1, %s2721_s10  ;;  %s2733_s16 = scalar_lea.vmem %s3762_s0, %s2721_s10 }
  0x11   : > { %2414 = vmatpush3.msra.mxu0 %v365_v3  ;;  %v332_v5 = vld [vmem:[%s2727_s13] sm:$0xff]  ;;  %v333_v7 = vld [vmem:[%s2727_s13 + $0x8] sm:$0xff]  ;;  %v334_v9 = vld [vmem:[%s2727_s13 + $0x10] sm:$0xff]  ;;  %s2780_s19 = scalar_lea.vmem %s3764_s2, %s2721_s10  ;;  %s3629_s27 = scalar_lea.vmem %s3768_s6, %s2721_s10 }
  0x12   : > { %2415 = vmatprep.subr.mxu0 %v364_v4  ;;  %v299_v6 = vld [vmem:[%s2733_s16] sm:$0xff]  ;;  %2417 = vmatprep.mubr.msk.f32.mxu0 %vm368_vm1, %v332_v5  ;;  %v300_v8 = vld [vmem:[%s2733_s16 + $0x8] sm:$0xff]  ;;  %v301_v10 = vld [vmem:[%s2733_s16 + $0x10] sm:$0xff] }
  0x13   : > { %2416 = vmatpush3.msra.mxu0 %v364_v4  ;;  %2467 = vmatprep.mubr.msk.f32.mxu1 %vm690_vm2, %v299_v6  ;;  %v335_v11 = vld [vmem:[%s2727_s13 + $0x18] sm:$0xff]  ;;  %v336_v13 = vld [vmem:[%s2727_s13 + $0x20] sm:$0xff]  ;;  %v337_v15 = vld [vmem:[%s2727_s13 + $0x28] sm:$0xff] }
  0x14   : > { %2418 = vmatmul.mubr.msk.f32.vlgmr.msra.gmra.mxu0 %vm368_vm1, %v333_v7  ;;  %2468 = vmatmul.mubr.msk.f32.vlgmr.msra.gmra.mxu1 %vm690_vm2, %v300_v8  ;;  %v302_v12 = vld [vmem:[%s2733_s16 + $0x18] sm:$0xff]  ;;  %v303_v14 = vld [vmem:[%s2733_s16 + $0x20] sm:$0xff]  ;;  %v304_v16 = vld [vmem:[%s2733_s16 + $0x28] sm:$0xff] }
  0x15   : > { %2420 = vmatprep.mubr.msk.f32.mxu0 %vm368_vm1, %v334_v9  ;;  %2470 = vmatprep.mubr.msk.f32.mxu1 %vm690_vm2, %v301_v10  ;;  %v338_v17 = vld [vmem:[%s2727_s13 + $0x30] sm:$0xff]  ;;  %v339_v19 = vld [vmem:[%s2727_s13 + $0x38] sm:$0xff]  ;;  %v340_v21 = vld [vmem:[%s2727_s13 + $0x40] sm:$0xff] }
  0x16   : > { %v305_v18 = vld [vmem:[%s2733_s16 + $0x30] sm:$0xff]  ;;  %v306_v20 = vld [vmem:[%s2733_s16 + $0x38] sm:$0xff]  ;;  %v307_v22 = vld [vmem:[%s2733_s16 + $0x40] sm:$0xff] }
  0x17   : > { %v341_v23 = vld [vmem:[%s2727_s13 + $0x48] sm:$0xff]  ;;  %v342_v25 = vld [vmem:[%s2727_s13 + $0x50] sm:$0xff]  ;;  %v343_v27 = vld [vmem:[%s2727_s13 + $0x58] sm:$0xff] }
  0x18   : > { %2421 = vmatmul.mubr.msk.f32.gmra.mxu0 %vm368_vm1, %v335_v11  ;;  %2471 = vmatmul.mubr.msk.f32.gmra.mxu1 %vm690_vm2, %v302_v12  ;;  %v308_v24 = vld [vmem:[%s2733_s16 + $0x48] sm:$0xff]  ;;  %v309_v26 = vld [vmem:[%s2733_s16 + $0x50] sm:$0xff]  ;;  %v310_v28 = vld [vmem:[%s2733_s16 + $0x58] sm:$0xff] }
  0x19   : > { %2423 = vmatprep.mubr.msk.f32.mxu0 %vm368_vm1, %v336_v13  ;;  %2473 = vmatprep.mubr.msk.f32.mxu1 %vm690_vm2, %v303_v14  ;;  %v344_v29 = vld [vmem:[%s2727_s13 + $0x60] sm:$0xff]  ;;  %v1284_v32 = vld [vmem:[%s2780_s19 + $0x10] sm:$0xff]  ;;  %v345_v33 = vld [vmem:[%s2727_s13 + $0x68] sm:$0xff] }
  0x1a   : > { %v311_v30 = vld [vmem:[%s2733_s16 + $0x60] sm:$0xff]  ;;  %v1283_v34 = vld [vmem:[%s2780_s19 + $0x8] sm:$0xff]  ;;  %v346_v36 = vld [vmem:[%s2727_s13 + $0x70] sm:$0xff]  ;;  %1350 = vrot.lane.b32.xlu1 %v1284_v32, %s2661_s20 }
  0x1b   : > { %v1282_v31 = vld [vmem:[%s2780_s19] sm:$0xff]  ;;  %v312_v35 = vld [vmem:[%s2733_s16 + $0x68] sm:$0xff]  ;;  %v313_v37 = vld [vmem:[%s2733_s16 + $0x70] sm:$0xff] }
  0x1c   : > { %2424 = vmatmul.mubr.msk.f32.gmra.mxu0 %vm368_vm1, %v337_v15  ;;  %2474 = vmatmul.mubr.msk.f32.gmra.mxu1 %vm690_vm2, %v304_v16  ;;  %v1285_v38 = vld [vmem:[%s2780_s19 + $0x18] sm:$0xff]  ;;  %v1286_v40 = vld [vmem:[%s2780_s19 + $0x20] sm:$0xff]  ;;  %v1287_v44 = vld [vmem:[%s2780_s19 + $0x28] sm:$0xff] }
  0x1d   : > { %2426 = vmatprep.mubr.msk.f32.mxu0 %vm368_vm1, %v338_v17  ;;  %2476 = vmatprep.mubr.msk.f32.mxu1 %vm690_vm2, %v305_v18  ;;  %v347_v39 = vld [vmem:[%s2727_s13 + $0x78] sm:$0xff]  ;;  %v348_v42 = vld [vmem:[%s2727_s13 + $0x80] sm:$0xff]  ;;  %v349_v45 = vld [vmem:[%s2727_s13 + $0x88] sm:$0xff] }
  0x1e   : > { %1346 = vrot.lane.b32.xlu0 %v1282_v31, %s2661_s20  ;;  %v314_v41 = vld [vmem:[%s2733_s16 + $0x78] sm:$0xff]  ;;  %1352 = vrot.lane.b32.xlu1 %v1285_v38, %s2661_s20  ;;  %v315_v43 = vld [vmem:[%s2733_s16 + $0x80] sm:$0xff] }
  0x1f   : > { %v1288_v46 = vld [vmem:[%s2780_s19 + $0x30] sm:$0xff]  ;;  %v316_v47 = vld [vmem:[%s2733_s16 + $0x88] sm:$0xff]  ;;  %v1289_v50 = vld [vmem:[%s2780_s19 + $0x38] sm:$0xff] }
  0x20   : > { %2427 = vmatmul.mubr.msk.f32.gmra.mxu0 %vm368_vm1, %v339_v19  ;;  %2477 = vmatmul.mubr.msk.f32.gmra.mxu1 %vm690_vm2, %v306_v20  ;;  %v350_v48 = vld [vmem:[%s2727_s13 + $0x90] sm:$0xff]  ;;  %v351_v51 = vld [vmem:[%s2727_s13 + $0x98] sm:$0xff]  ;;  %v1290_v52 = vld [vmem:[%s2780_s19 + $0x40] sm:$0xff] }
  0x21   : > { %2429 = vmatprep.mubr.msk.f32.mxu0 %vm368_vm1, %v340_v21  ;;  %2479 = vmatprep.mubr.msk.f32.mxu1 %vm690_vm2, %v307_v22  ;;  %v317_v49 = vld [vmem:[%s2733_s16 + $0x90] sm:$0xff]  ;;  %v318_v53 = vld [vmem:[%s2733_s16 + $0x98] sm:$0xff]  ;;  %v352_v54 = vld [vmem:[%s2727_s13 + $0xa0] sm:$0xff] }
  0x22   : > { %1348 = vrot.lane.b32.xlu0 %v1283_v34, %s2661_s20  ;;  %1356 = vrot.lane.b32.xlu1 %v1287_v44, %s2661_s20  ;;  %v319_v55 = vld [vmem:[%s2733_s16 + $0xa0] sm:$0xff]  ;;  %v1291_v56 = vld [vmem:[%s2780_s19 + $0x48] sm:$0xff] }
  0x23   : > { %v353_v57 = vld [vmem:[%s2727_s13 + $0xa8] sm:$0xff]  ;;  %v1292_v58 = vld [vmem:[%s2780_s19 + $0x50] sm:$0xff]  ;;  %v1293_v62 = vld [vmem:[%s2780_s19 + $0x58] sm:$0xff] }
  0x24   : > { %2430 = vmatmul.mubr.msk.f32.gmra.mxu0 %vm368_vm1, %v341_v23  ;;  %2480 = vmatmul.mubr.msk.f32.gmra.mxu1 %vm690_vm2, %v308_v24  ;;  %v320_v59 = vld [vmem:[%s2733_s16 + $0xa8] sm:$0xff]  ;;  %v354_v60 = vld [vmem:[%s2727_s13 + $0xb0] sm:$0xff]  ;;  %v355_v63 = vld [vmem:[%s2727_s13 + $0xb8] sm:$0xff] }
  0x25   : > { %2432 = vmatprep.mubr.msk.f32.mxu0 %vm368_vm1, %v342_v25  ;;  %2482 = vmatprep.mubr.msk.f32.mxu1 %vm690_vm2, %v309_v26  ;;  %v321_v61 = vld [vmem:[%s2733_s16 + $0xb0] sm:$0xff]  ;;  %v1294_v0 = vld [vmem:[%s2780_s19 + $0x60] sm:$0xff]  ;;  %v322_v1 = vld [vmem:[%s2733_s16 + $0xb8] sm:$0xff] }
  0x26   : > { %1354 = vrot.lane.b32.xlu0 %v1286_v40, %s2661_s20  ;;  %1360 = vrot.lane.b32.xlu1 %v1289_v50, %s2661_s20  ;;  %v356_v2 = vld [vmem:[%s2727_s13 + $0xc0] sm:$0xff]  ;;  %v1295_v4 = vld [vmem:[%s2780_s19 + $0x68] sm:$0xff] }
  0x27   : > { %v323_v3 = vld [vmem:[%s2733_s16 + $0xc0] sm:$0xff]  ;;  %v357_v5 = vld [vmem:[%s2727_s13 + $0xc8] sm:$0xff]  ;;  %v1296_v6 = vld [vmem:[%s2780_s19 + $0x70] sm:$0xff] }
  0x28   : > { %2433 = vmatmul.mubr.msk.f32.gmra.mxu0 %vm368_vm1, %v343_v27  ;;  %2483 = vmatmul.mubr.msk.f32.gmra.mxu1 %vm690_vm2, %v310_v28  ;;  %v324_v7 = vld [vmem:[%s2733_s16 + $0xc8] sm:$0xff]  ;;  %v358_v8 = vld [vmem:[%s2727_s13 + $0xd0] sm:$0xff]  ;;  %v1297_v10 = vld [vmem:[%s2780_s19 + $0x78] sm:$0xff] }
  0x29   : > { %2435 = vmatprep.mubr.msk.f32.mxu0 %vm368_vm1, %v344_v29  ;;  %2485 = vmatprep.mubr.msk.f32.mxu1 %vm690_vm2, %v311_v30  ;;  %v325_v9 = vld [vmem:[%s2733_s16 + $0xd0] sm:$0xff]  ;;  %v359_v11 = vld [vmem:[%s2727_s13 + $0xd8] sm:$0xff]  ;;  %v1298_v12 = vld [vmem:[%s2780_s19 + $0x80] sm:$0xff] }
  0x2a   : > { %1358 = vrot.lane.b32.xlu0 %v1288_v46, %s2661_s20  ;;  %1364 = vrot.lane.b32.xlu1 %v1291_v56, %s2661_s20  ;;  %v326_v13 = vld [vmem:[%s2733_s16 + $0xd8] sm:$0xff]  ;;  %v360_v14 = vld [vmem:[%s2727_s13 + $0xe0] sm:$0xff] }
  0x2b   : > { %v327_v15 = vld [vmem:[%s2733_s16 + $0xe0] sm:$0xff]  ;;  %v1299_v16 = vld [vmem:[%s2780_s19 + $0x88] sm:$0xff]  ;;  %v1300_v18 = vld [vmem:[%s2780_s19 + $0x90] sm:$0xff] }
  0x2c   : > { %2436 = vmatmul.mubr.msk.f32.gmra.mxu0 %vm368_vm1, %v345_v33  ;;  %2486 = vmatmul.mubr.msk.f32.gmra.mxu1 %vm690_vm2, %v312_v35  ;;  %v361_v17 = vld [vmem:[%s2727_s13 + $0xe8] sm:$0xff]  ;;  %v362_v20 = vld [vmem:[%s2727_s13 + $0xf0] sm:$0xff]  ;;  %v1301_v22 = vld [vmem:[%s2780_s19 + $0x98] sm:$0xff] }
  0x2d   : > { %2438 = vmatprep.mubr.msk.f32.mxu0 %vm368_vm1, %v346_v36  ;;  %2488 = vmatprep.mubr.msk.f32.mxu1 %vm690_vm2, %v313_v37  ;;  %v328_v19 = vld [vmem:[%s2733_s16 + $0xe8] sm:$0xff]  ;;  %v329_v21 = vld [vmem:[%s2733_s16 + $0xf0] sm:$0xff]  ;;  %v363_v23 = vld [vmem:[%s2727_s13 + $0xf8] sm:$0xff]  ;;  %v1087_v37 = vlaneseq }
  0x2e   : > { %1362 = vrot.lane.b32.xlu0 %v1290_v52, %s2661_s20  ;;  %1368 = vrot.lane.b32.xlu1 %v1293_v62, %s2661_s20  ;;  %v1302_v24 = vld [vmem:[%s2780_s19 + $0xa0] sm:$0xff]  ;;  %v330_v25 = vld [vmem:[%s2733_s16 + $0xf8] sm:$0xff] }
  0x2f   : > { %v1303_v26 = vld [vmem:[%s2780_s19 + $0xa8] sm:$0xff]  ;;  %v1304_v27 = vld [vmem:[%s2780_s19 + $0xb0] sm:$0xff]  ;;  %v1305_v28 = vld [vmem:[%s2780_s19 + $0xb8] sm:$0xff] }
  0x30   : > { %2439 = vmatmul.mubr.msk.f32.gmra.mxu0 %vm368_vm1, %v347_v39  ;;  %2489 = vmatmul.mubr.msk.f32.gmra.mxu1 %vm690_vm2, %v314_v41  ;;  %v1306_v29 = vld [vmem:[%s2780_s19 + $0xc0] sm:$0xff]  ;;  %v1307_v30 = vld [vmem:[%s2780_s19 + $0xc8] sm:$0xff]  ;;  %v1308_v31 = vld [vmem:[%s2780_s19 + $0xd0] sm:$0xff] }
  0x31   : > { %2441 = vmatprep.mubr.msk.f32.mxu0 %vm368_vm1, %v348_v42  ;;  %2491 = vmatprep.mubr.msk.f32.mxu1 %vm690_vm2, %v315_v43  ;;  %v1309_v32 = vld [vmem:[%s2780_s19 + $0xd8] sm:$0xff]  ;;  %v1310_v33 = vld [vmem:[%s2780_s19 + $0xe0] sm:$0xff]  ;;  %v1311_v34 = vld [vmem:[%s2780_s19 + $0xe8] sm:$0xff]  ;;  %v2938_v43 = vand.u32 127, %v1087_v37 }
  0x32   : > { %1366 = vrot.lane.b32.xlu0 %v1292_v58, %s2661_s20  ;;  %1372 = vrot.lane.b32.xlu1 %v1295_v4, %s2661_s20  ;;  %v1312_v35 = vld [vmem:[%s2780_s19 + $0xf0] sm:$0xff]  ;;  %v1313_v36 = vld [vmem:[%s2780_s19 + $0xf8] sm:$0xff] }
  0x33   : > { %v2936_v40 = vld [vmem:[%s3767_s5] ss:$0 sm:$0xff]  ;;  %vm1089_vm3 = vcmp.ge.s32.totalorder %v2938_v43, 96 }
  0x34   : > { %2442 = vmatmul.mubr.msk.f32.gmra.mxu0 %vm368_vm1, %v349_v45  ;;  %2492 = vmatmul.mubr.msk.f32.gmra.mxu1 %vm690_vm2, %v316_v47 }
  0x35   : > { %2444 = vmatprep.mubr.msk.f32.mxu0 %vm368_vm1, %v350_v48  ;;  %2494 = vmatprep.mubr.msk.f32.mxu1 %vm690_vm2, %v317_v49 }
  0x36   : > { %1370 = vrot.lane.b32.xlu0 %v1294_v0, %s2661_s20  ;;  %1376 = vrot.lane.b32.xlu1 %v1297_v10, %s2661_s20 }
  0x38   : > { %2445 = vmatmul.mubr.msk.f32.gmra.mxu0 %vm368_vm1, %v351_v51  ;;  %2495 = vmatmul.mubr.msk.f32.gmra.mxu1 %vm690_vm2, %v318_v53 }
  0x39   : > { %2447 = vmatprep.mubr.msk.f32.mxu0 %vm368_vm1, %v352_v54  ;;  %2497 = vmatprep.mubr.msk.f32.mxu1 %vm690_vm2, %v319_v55 }
  0x3a   : > { %1374 = vrot.lane.b32.xlu0 %v1296_v6, %s2661_s20  ;;  %1380 = vrot.lane.b32.xlu1 %v1299_v16, %s2661_s20 }
  0x3c   : > { %2448 = vmatmul.mubr.msk.f32.gmra.mxu0 %vm368_vm1, %v353_v57  ;;  %2498 = vmatmul.mubr.msk.f32.gmra.mxu1 %vm690_vm2, %v320_v59 }
  0x3d   : > { %2450 = vmatprep.mubr.msk.f32.mxu0 %vm368_vm1, %v354_v60  ;;  %2500 = vmatprep.mubr.msk.f32.mxu1 %vm690_vm2, %v321_v61 }
  0x3e   : > { %1378 = vrot.lane.b32.xlu0 %v1298_v12, %s2661_s20  ;;  %1384 = vrot.lane.b32.xlu1 %v1301_v22, %s2661_s20 }
  0x40   : > { %2451 = vmatmul.mubr.msk.f32.gmra.mxu0 %vm368_vm1, %v355_v63  ;;  %2501 = vmatmul.mubr.msk.f32.gmra.mxu1 %vm690_vm2, %v322_v1 }
  0x41   : > { %2453 = vmatprep.mubr.msk.f32.mxu0 %vm368_vm1, %v356_v2  ;;  %2503 = vmatprep.mubr.msk.f32.mxu1 %vm690_vm2, %v323_v3 }
  0x42   : > { %1382 = vrot.lane.b32.xlu0 %v1300_v18, %s2661_s20  ;;  %1388 = vrot.lane.b32.xlu1 %v1303_v26, %s2661_s20 }
  0x44   : > { %2454 = vmatmul.mubr.msk.f32.gmra.mxu0 %vm368_vm1, %v357_v5  ;;  %2504 = vmatmul.mubr.msk.f32.gmra.mxu1 %vm690_vm2, %v324_v7 }
  0x45   : > { %2456 = vmatprep.mubr.msk.f32.mxu0 %vm368_vm1, %v358_v8  ;;  %2506 = vmatprep.mubr.msk.f32.mxu1 %vm690_vm2, %v325_v9 }
  0x46   : > { %1386 = vrot.lane.b32.xlu0 %v1302_v24, %s2661_s20  ;;  %1392 = vrot.lane.b32.xlu1 %v1305_v28, %s2661_s20 }
  0x48   : > { %2457 = vmatmul.mubr.msk.f32.gmra.mxu0 %vm368_vm1, %v359_v11  ;;  %2507 = vmatmul.mubr.msk.f32.gmra.mxu1 %vm690_vm2, %v326_v13 }
  0x49   : > { %2459 = vmatprep.mubr.msk.f32.mxu0 %vm368_vm1, %v360_v14  ;;  %2509 = vmatprep.mubr.msk.f32.mxu1 %vm690_vm2, %v327_v15 }
  0x4a   : > { %1390 = vrot.lane.b32.xlu0 %v1304_v27, %s2661_s20  ;;  %1396 = vrot.lane.b32.xlu1 %v1307_v30, %s2661_s20 }
  0x4c   : > { %2460 = vmatmul.mubr.msk.f32.gmra.mxu0 %vm368_vm1, %v361_v17  ;;  %2510 = vmatmul.mubr.msk.f32.gmra.mxu1 %vm690_vm2, %v328_v19 }
  0x4d   : > { %2462 = vmatprep.mubr.msk.f32.mxu0 %vm368_vm1, %v362_v20  ;;  %2512 = vmatprep.mubr.msk.f32.mxu1 %vm690_vm2, %v329_v21 }
  0x4e   : > { %1394 = vrot.lane.b32.xlu0 %v1306_v29, %s2661_s20  ;;  %1400 = vrot.lane.b32.xlu1 %v1309_v32, %s2661_s20 }
  0x50   : > { %2463 = vmatmul.mubr.msk.f32.gmra.mxu0 %vm368_vm1, %v363_v23  ;;  %2513 = vmatmul.mubr.msk.f32.gmra.mxu1 %vm690_vm2, %v330_v25 }
  0x52   : > { %1398 = vrot.lane.b32.xlu0 %v1308_v31, %s2661_s20  ;;  %1404 = vrot.lane.b32.xlu1 %v1311_v34, %s2661_s20 }
  0x56   : > { %1402 = vrot.lane.b32.xlu0 %v1310_v33, %s2661_s20  ;;  %1408 = vrot.lane.b32.xlu1 %v1313_v36, %s2661_s20 }
  0x5a   : > { %1406 = vrot.lane.b32.xlu0 %v1312_v35, %s2661_s20 }
  0xd4   : > { %v2419_v38 = vpop.f32.mrf.mxu0  ;;  %v2469_v39 = vpop.f32.mrf.mxu1 }
  0xd5   : > { %v863_v41 = vadd.f32 %v2469_v39, %v2419_v38 }
  0xd6   : > { %v531_v42 = vpop.f32.mrf.mxu0  ;;  %v857_v44 = vpop.f32.mrf.mxu1 }
  0xd7   : > { %v1024_v45 = vadd.f32 %v2936_v40, %v863_v41  ;;  %v858_v46 = vadd.f32 %v857_v44, %v531_v42 }
  0xd8   : > { %v2422_v47 = vpop.f32.mrf.mxu0  ;;  %v2472_v48 = vpop.f32.mrf.mxu1 }
  0xd9   : > { %v1056_v49 = vmax.f32 %v1024_v45, 0.0  ;;  %v1023_v50 = vadd.f32 %v2936_v40, %v858_v46  ;;  %v873_v51 = vadd.f32 %v2472_v48, %v2422_v47 }
  0xda   : > { %v541_v52 = vpop.f32.mrf.mxu0  ;;  %v867_v53 = vpop.f32.mrf.mxu1 }
  0xdb   : > { %v1091_v54 = vmul.f32 0.5, %v1056_v49  ;;  %v1055_v55 = vmax.f32 %v1023_v50, 0.0  ;;  %v1026_v56 = vadd.f32 %v2936_v40, %v873_v51  ;;  %v868_v57 = vadd.f32 %v867_v53, %v541_v52 }
  0xdc   : > { %v2425_v58 = vpop.f32.mrf.mxu0  ;;  %v2475_v59 = vpop.f32.mrf.mxu1 }
  0xdd   : > { %v1123_v60 = vsel %vm1089_vm3, %v1056_v49, %v1091_v54  ;;  %v1090_v61 = vmul.f32 0.5, %v1055_v55  ;;  %v1058_v62 = vmax.f32 %v1026_v56, 0.0  ;;  %v1025_v63 = vadd.f32 %v2936_v40, %v868_v57 }
  0xde   : > { %v551_v0 = vpop.f32.mrf.mxu0  ;;  %2525 = vtanh.f32 %v1123_v60  ;;  %v883_v1 = vadd.f32 %v2475_v59, %v2425_v58  ;;  %v877_v2 = vpop.f32.mrf.mxu1 }
  0xdf   : > { %v1122_v3 = vsel %vm1089_vm3, %v1055_v55, %v1090_v61  ;;  %v1093_v4 = vmul.f32 0.5, %v1058_v62  ;;  %v1057_v5 = vmax.f32 %v1025_v63, 0.0  ;;  %v878_v6 = vadd.f32 %v877_v2, %v551_v0 }
  0xe0   : > { %v2428_v7 = vpop.f32.mrf.mxu0  ;;  %2527 = vtanh.f32 %v1122_v3  ;;  %v1028_v8 = vadd.f32 %v2936_v40, %v883_v1  ;;  %v2478_v9 = vpop.f32.mrf.mxu1 }
  0xe1   : > { %v1125_v10 = vsel %vm1089_vm3, %v1058_v62, %v1093_v4  ;;  %v1092_v11 = vmul.f32 0.5, %v1057_v5  ;;  %v1027_v12 = vadd.f32 %v2936_v40, %v878_v6  ;;  %v893_v13 = vadd.f32 %v2478_v9, %v2428_v7 }
  0xe2   : > { %v561_v14 = vpop.f32.mrf.mxu0  ;;  %2529 = vtanh.f32 %v1125_v10  ;;  %v1060_v15 = vmax.f32 %v1028_v8, 0.0  ;;  %v887_v16 = vpop.f32.mrf.mxu1 }
  0xe3   : > { %v1124_v17 = vsel %vm1089_vm3, %v1057_v5, %v1092_v11  ;;  %v1059_v18 = vmax.f32 %v1027_v12, 0.0  ;;  %v1030_v19 = vadd.f32 %v2936_v40, %v893_v13  ;;  %v888_v20 = vadd.f32 %v887_v16, %v561_v14 }
  0xe4   : > { %v2431_v21 = vpop.f32.mrf.mxu0  ;;  %2531 = vtanh.f32 %v1124_v17  ;;  %v1095_v22 = vmul.f32 0.5, %v1060_v15  ;;  %v2481_v23 = vpop.f32.mrf.mxu1 }
  0xe5   : > { %v1094_v24 = vmul.f32 0.5, %v1059_v18  ;;  %v1062_v25 = vmax.f32 %v1030_v19, 0.0  ;;  %v1029_v26 = vadd.f32 %v2936_v40, %v888_v20  ;;  %v903_v27 = vadd.f32 %v2481_v23, %v2431_v21 }
  0xe6   : > { %v571_v28 = vpop.f32.mrf.mxu0  ;;  %v1127_v29 = vsel %vm1089_vm3, %v1060_v15, %v1095_v22  ;;  %v897_v30 = vpop.f32.mrf.mxu1 }
  0xe7   : > { %v1097_v31 = vmul.f32 0.5, %v1062_v25  ;;  %v1061_v32 = vmax.f32 %v1029_v26, 0.0  ;;  %2533 = vtanh.f32 %v1127_v29  ;;  %v1126_v34 = vsel %vm1089_vm3, %v1059_v18, %v1094_v24 }
  0xe8   : > { %v2434_v33 = vpop.f32.mrf.mxu0  ;;  %v1032_v35 = vadd.f32 %v2936_v40, %v903_v27  ;;  %v898_v36 = vadd.f32 %v897_v30, %v571_v28  ;;  %v2484_v37 = vpop.f32.mrf.mxu1  ;;  %2535 = vtanh.f32 %v1126_v34 }
  0xe9   : > { %v1096_v38 = vmul.f32 0.5, %v1061_v32  ;;  %v913_v39 = vadd.f32 %v2484_v37, %v2434_v33  ;;  %v1129_v47 = vsel %vm1089_vm3, %v1062_v25, %v1097_v31 }
  0xea   : > { %v581_v41 = vpop.f32.mrf.mxu0  ;;  %v1064_v42 = vmax.f32 %v1032_v35, 0.0  ;;  %v1031_v44 = vadd.f32 %v2936_v40, %v898_v36  ;;  %v907_v45 = vpop.f32.mrf.mxu1  ;;  %2537 = vtanh.f32 %v1129_v47 }
  0xeb   : > { %v2526_v46 = vpop.eup %2525  ;;  %v1034_v48 = vadd.f32 %v2936_v40, %v913_v39  ;;  %v908_v49 = vadd.f32 %v907_v45, %v581_v41  ;;  %v1128_v51 = vsel %vm1089_vm3, %v1061_v32, %v1096_v38 }
  0xec   : > { %v2437_v50 = vpop.f32.mrf.mxu0  ;;  %v1099_v52 = vmul.f32 0.5, %v1064_v42  ;;  %v1063_v53 = vmax.f32 %v1031_v44, 0.0  ;;  %v2487_v54 = vpop.f32.mrf.mxu1  ;;  %v1187_v55 = vadd.f32 1.0, %v2526_v46  ;;  %2539 = vtanh.f32 %v1128_v51 }
  0xed   : > { %v2528_v56 = vpop.eup %2527  ;;  %v1066_v57 = vmax.f32 %v1034_v48, 0.0  ;;  %v1033_v58 = vadd.f32 %v2936_v40, %v908_v49  ;;  %v923_v59 = vadd.f32 %v2487_v54, %v2437_v50 }
  0xee   : > { %v591_v60 = vpop.f32.mrf.mxu0  ;;  %v1098_v61 = vmul.f32 0.5, %v1063_v53  ;;  %v1186_v62 = vadd.f32 1.0, %v2528_v56  ;;  %v917_v63 = vpop.f32.mrf.mxu1  ;;  %v1219_v0 = vmul.f32 0.5, %v1187_v55  ;;  %v1131_v6 = vsel %vm1089_vm3, %v1064_v42, %v1099_v52 }
  0xef   : > { %v2530_v1 = vpop.eup %2529  ;;  %v1101_v2 = vmul.f32 0.5, %v1066_v57  ;;  %v1065_v3 = vmax.f32 %v1033_v58, 0.0  ;;  %v1036_v4 = vadd.f32 %v2936_v40, %v923_v59  ;;  %v918_v8 = vadd.f32 %v917_v63, %v591_v60 }
  0xf0   : > { %v2440_v5 = vpop.f32.mrf.mxu0  ;;  %v1218_v7 = vmul.f32 0.5, %v1186_v62  ;;  %v2974_v9 = vsel %vm1089_vm3, %v2526_v46, %v1219_v0  ;;  %v2490_v10 = vpop.f32.mrf.mxu1  ;;  %v1130_v12 = vsel %vm1089_vm3, %v1063_v53, %v1098_v61  ;;  %2541 = vtanh.f32 %v1131_v6 }
  0xf1   : > { %v2532_v11 = vpop.eup %2531  ;;  %v1133_v13 = vsel %vm1089_vm3, %v1066_v57, %v1101_v2  ;;  %v1100_v14 = vmul.f32 0.5, %v1065_v3  ;;  %1508 = vrot.lane.b32.xlu1 %v2974_v9, %s2661_s20  ;;  %v1068_v17 = vmax.f32 %v1036_v4, 0.0  ;;  %v1035_v18 = vadd.f32 %v2936_v40, %v918_v8 }
  0xf2   : > { %v601_v15 = vpop.f32.mrf.mxu0  ;;  %v2984_v16 = vsel %vm1089_vm3, %v2528_v56, %v1218_v7  ;;  %v1188_v19 = vadd.f32 1.0, %v2532_v11  ;;  %v927_v20 = vpop.f32.mrf.mxu1  ;;  %2543 = vtanh.f32 %v1130_v12  ;;  %v933_v24 = vadd.f32 %v2490_v10, %v2440_v5 }
  0xf3   : > { %1506 = vrot.lane.b32.xlu0 %v2984_v16, %s2661_s20  ;;  %v1067_v22 = vmax.f32 %v1035_v18, 0.0  ;;  %2545 = vtanh.f32 %v1133_v13  ;;  %v928_v27 = vadd.f32 %v927_v20, %v601_v15  ;;  %v1189_v28 = vadd.f32 1.0, %v2530_v1 }
  0xf4   : > { %v2443_v21 = vpop.f32.mrf.mxu0  ;;  %v1220_v23 = vmul.f32 0.5, %v1188_v19  ;;  %v2493_v25 = vpop.f32.mrf.mxu1  ;;  %v1132_v31 = vsel %vm1089_vm3, %v1065_v3, %v1100_v14  ;;  %v1103_v32 = vmul.f32 0.5, %v1068_v17  ;;  %v1038_v34 = vadd.f32 %v2936_v40, %v933_v24 }
  0xf5   : > { %v2534_v26 = vpop.eup %2533  ;;  %v943_v29 = vadd.f32 %v2493_v25, %v2443_v21  ;;  %v1102_v36 = vmul.f32 0.5, %v1067_v22  ;;  %v1037_v37 = vadd.f32 %v2936_v40, %v928_v27  ;;  %v1221_v38 = vmul.f32 0.5, %v1189_v28 }
  0xf6   : > { %v611_v30 = vpop.f32.mrf.mxu0  ;;  %v2993_v33 = vsel %vm1089_vm3, %v2532_v11, %v1220_v23  ;;  %v937_v35 = vpop.f32.mrf.mxu1  ;;  %v1070_v44 = vmax.f32 %v1038_v34, 0.0  ;;  %v1191_v46 = vadd.f32 1.0, %v2534_v26  ;;  %2547 = vtanh.f32 %v1132_v31 }
  0xf7   : > { %v1040_v39 = vadd.f32 %v2936_v40, %v943_v29  ;;  %1510 = vrot.lane.b32.xlu0 %v2993_v33, %s2661_s20  ;;  %v2536_v42 = vpop.eup %2535  ;;  %v938_v45 = vadd.f32 %v937_v35, %v611_v30  ;;  %v1069_v48 = vmax.f32 %v1037_v37, 0.0  ;;  %v3002_v49 = vsel %vm1089_vm3, %v2530_v1, %v1221_v38 }
  0xf8   : > { %v2446_v41 = vpop.f32.mrf.mxu0  ;;  %v2496_v47 = vpop.f32.mrf.mxu1  ;;  %v1135_v52 = vsel %vm1089_vm3, %v1068_v17, %v1103_v32  ;;  %v1105_v53 = vmul.f32 0.5, %v1070_v44  ;;  %1512 = vrot.lane.b32.xlu1 %v3002_v49, %s2661_s20  ;;  %v1223_v55 = vmul.f32 0.5, %v1191_v46  ;;  %v1134_v58 = vsel %vm1089_vm3, %v1067_v22, %v1102_v36 }
  0xf9   : > { %v1072_v50 = vmax.f32 %v1040_v39, 0.0  ;;  %v1039_v54 = vadd.f32 %v2936_v40, %v938_v45  ;;  %v2538_v57 = vpop.eup %2537  ;;  %v1104_v59 = vmul.f32 0.5, %v1069_v48  ;;  %v953_v60 = vadd.f32 %v2496_v47, %v2446_v41  ;;  %v3046_v46 = vpop.permute.xlu1 %1350 }
  0xfa   : > { %v621_v51 = vpop.f32.mrf.mxu0  ;;  %v947_v56 = vpop.f32.mrf.mxu1  ;;  %v1190_v61 = vadd.f32 1.0, %v2536_v42  ;;  %v1137_v0 = vsel %vm1089_vm3, %v1070_v44, %v1105_v53  ;;  %v3015_v2 = vsel %vm1089_vm3, %v2534_v26, %v1223_v55  ;;  %2549 = vtanh.f32 %v1135_v52 }
  0xfb   : > { %v2540_v63 = vpop.eup %2539  ;;  %v1071_v1 = vmax.f32 %v1039_v54, 0.0  ;;  %v948_v3 = vadd.f32 %v947_v56, %v621_v51  ;;  %v1107_v5 = vmul.f32 0.5, %v1072_v50  ;;  %2551 = vtanh.f32 %v1134_v58 }
  0xfc   : > { %v2449_v62 = vpop.f32.mrf.mxu0  ;;  %v2499_v4 = vpop.f32.mrf.mxu1  ;;  %v1042_v8 = vadd.f32 %v2936_v40, %v953_v60  ;;  %1516 = vrot.lane.b32.xlu1 %v3015_v2, %s2661_s20  ;;  %v1222_v10 = vmul.f32 0.5, %v1190_v61  ;;  %2553 = vtanh.f32 %v1137_v0  ;;  %v1193_v13 = vadd.f32 1.0, %v2538_v57 }
  0xfd   : > { %v1106_v7 = vmul.f32 0.5, %v1071_v1  ;;  %v1041_v12 = vadd.f32 %v2936_v40, %v948_v3  ;;  %v963_v14 = vadd.f32 %v2499_v4, %v2449_v62  ;;  %v2542_v17 = vpop.eup %2541  ;;  %v1136_v18 = vsel %vm1089_vm3, %v1069_v48, %v1104_v59  ;;  %v3055_v61 = vpop.permute.xlu0 %1346 }
  0xfe   : > { %v631_v6 = vpop.f32.mrf.mxu0  ;;  %v957_v11 = vpop.f32.mrf.mxu1  ;;  %v1074_v19 = vmax.f32 %v1042_v8, 0.0  ;;  %v3025_v20 = vsel %vm1089_vm3, %v2536_v42, %v1222_v10  ;;  %v1192_v21 = vadd.f32 1.0, %v2540_v63  ;;  %v1139_v24 = vsel %vm1089_vm3, %v1072_v50, %v1107_v5 }
  0xff   : > { %v2544_v23 = vpop.eup %2543  ;;  %v1138_v25 = vsel %vm1089_vm3, %v1071_v1, %v1106_v7  ;;  %v1073_v26 = vmax.f32 %v1041_v12, 0.0  ;;  %1514 = vrot.lane.b32.xlu0 %v3025_v20, %s2661_s20  ;;  %v1225_v27 = vmul.f32 0.5, %v1193_v13  ;;  %v1044_v31 = vadd.f32 %v2936_v40, %v963_v14 }
 0x100   : > { %v2452_v15 = vpop.f32.mrf.mxu0  ;;  %v2502_v22 = vpop.f32.mrf.mxu1  ;;  %v1109_v30 = vmul.f32 0.5, %v1074_v19  ;;  %v1224_v32 = vmul.f32 0.5, %v1192_v21  ;;  %v958_v34 = vadd.f32 %v957_v11, %v631_v6  ;;  %2555 = vtanh.f32 %v1136_v18 }
 0x101   : > { %v3033_v29 = vpop.eup %2545  ;;  %v3038_v36 = vsel %vm1089_vm3, %v2538_v57, %v1225_v27  ;;  %v1195_v37 = vadd.f32 1.0, %v2542_v17  ;;  %v973_v38 = vadd.f32 %v2502_v22, %v2452_v15  ;;  %2557 = vtanh.f32 %v1139_v24 }
 0x102   : > { %v641_v28 = vpop.f32.mrf.mxu0  ;;  %v967_v35 = vpop.f32.mrf.mxu1  ;;  %v1108_v41 = vmul.f32 0.5, %v1073_v26  ;;  %v1076_v42 = vmax.f32 %v1044_v31, 0.0  ;;  %1520 = vrot.lane.b32.xlu1 %v3038_v36, %s2661_s20  ;;  %v3044_v44 = vsel %vm1089_vm3, %v2540_v63, %v1224_v32  ;;  %2559 = vtanh.f32 %v1138_v25 }
 0x103   : > { %v1043_v47 = vadd.f32 %v2936_v40, %v958_v34  ;;  %1518 = vrot.lane.b32.xlu0 %v3044_v44, %s2661_s20  ;;  %v2548_v50 = vpop.eup %2547  ;;  %v1141_v51 = vsel %vm1089_vm3, %v1074_v19, %v1109_v30  ;;  %v1227_v53 = vmul.f32 0.5, %v1195_v37  ;;  %v1046_v54 = vadd.f32 %v2936_v40, %v973_v38  ;;  %v3086_v31 = vpop.permute.xlu0 %1348 }
 0x104   : > { %v2455_v39 = vpop.f32.mrf.mxu0  ;;  %v2505_v45 = vpop.f32.mrf.mxu1  ;;  %v1111_v52 = vmul.f32 0.5, %v1076_v42  ;;  %v1194_v57 = vadd.f32 1.0, %v2544_v23  ;;  %v968_v58 = vadd.f32 %v967_v35, %v641_v28  ;;  %v1197_v59 = vadd.f32 1.0, %v3033_v29 }
 0x105   : > { %v1075_v56 = vmax.f32 %v1043_v47, 0.0  ;;  %v1140_v62 = vsel %vm1089_vm3, %v1073_v26, %v1108_v41  ;;  %v3061_v63 = vsel %vm1089_vm3, %v2542_v17, %v1227_v53  ;;  %v1078_v0 = vmax.f32 %v1046_v54, 0.0  ;;  %v3069_v17 = vpop.permute.xlu1 %1352 }
 0x106   : > { %v651_v48 = vpop.f32.mrf.mxu0  ;;  %v977_v55 = vpop.f32.mrf.mxu1  ;;  %v983_v1 = vadd.f32 %v2505_v45, %v2455_v39  ;;  %2561 = vtanh.f32 %v1141_v51  ;;  %v1143_v4 = vsel %vm1089_vm3, %v1076_v42, %v1111_v52  ;;  %1524 = vrot.lane.b32.xlu1 %v3061_v63, %s2661_s20  ;;  %v1226_v6 = vmul.f32 0.5, %v1194_v57 }
 0x107   : > { %v1110_v5 = vmul.f32 0.5, %v1075_v56  ;;  %v2550_v8 = vpop.eup %2549  ;;  %v1113_v10 = vmul.f32 0.5, %v1078_v0  ;;  %v1045_v11 = vadd.f32 %v2936_v40, %v968_v58  ;;  %v1229_v12 = vmul.f32 0.5, %v1197_v59  ;;  %v3108_v58 = vpop.permute.xlu0 %1354 }
 0x108   : > { %v2458_v60 = vpop.f32.mrf.mxu0  ;;  %v2508_v3 = vpop.f32.mrf.mxu1  ;;  %v1048_v13 = vadd.f32 %v2936_v40, %v983_v1  ;;  %2563 = vtanh.f32 %v1140_v62  ;;  %v3073_v18 = vsel %vm1089_vm3, %v2544_v23, %v1226_v6  ;;  %v1196_v19 = vadd.f32 1.0, %v2548_v50 }
 0x109   : > { %v2552_v15 = vpop.eup %2551  ;;  %v978_v21 = vadd.f32 %v977_v55, %v651_v48  ;;  %2565 = vtanh.f32 %v1143_v4  ;;  %v1077_v24 = vmax.f32 %v1045_v11, 0.0  ;;  %1522 = vrot.lane.b32.xlu0 %v3073_v18, %s2661_s20  ;;  %v1142_v27 = vsel %vm1089_vm3, %v1075_v56, %v1110_v5  ;;  %v3101_v54 = vpop.permute.xlu1 %1356 }
 0x10a   : > { %v661_v7 = vpop.f32.mrf.mxu0  ;;  %v987_v14 = vpop.f32.mrf.mxu1  ;;  %v3084_v28 = vsel %vm1089_vm3, %v3033_v29, %v1229_v12  ;;  %v1080_v23 = vmax.f32 %v1048_v13, 0.0  ;;  %v1228_v30 = vmul.f32 0.5, %v1196_v19  ;;  %v1145_v32 = vsel %vm1089_vm3, %v1078_v0, %v1113_v10 }
 0x10b   : > { %v3075_v22 = vpop.eup %2553  ;;  %v1112_v34 = vmul.f32 0.5, %v1077_v24  ;;  %1528 = vrot.lane.b32.xlu1 %v3084_v28, %s2661_s20  ;;  %v1047_v35 = vadd.f32 %v2936_v40, %v978_v21  ;;  %v1199_v37 = vadd.f32 1.0, %v2550_v8  ;;  %v993_v29 = vadd.f32 %v2508_v3, %v2458_v60 }
 0x10c   : > { %v2461_v25 = vpop.f32.mrf.mxu0  ;;  %v2511_v26 = vpop.f32.mrf.mxu1  ;;  %v1115_v38 = vmul.f32 0.5, %v1080_v23  ;;  %v3095_v39 = vsel %vm1089_vm3, %v2548_v50, %v1228_v30  ;;  %v1198_v41 = vadd.f32 1.0, %v2552_v15  ;;  %2567 = vtanh.f32 %v1142_v27 }
 0x10d   : > { %v2556_v42 = vpop.eup %2555  ;;  %v1144_v45 = vsel %vm1089_vm3, %v1077_v24, %v1112_v34  ;;  %v1079_v47 = vmax.f32 %v1047_v35, 0.0  ;;  %1526 = vrot.lane.b32.xlu0 %v3095_v39, %s2661_s20  ;;  %v1231_v48 = vmul.f32 0.5, %v1199_v37  ;;  %2569 = vtanh.f32 %v1145_v32  ;;  %v3127_v24 = vpop.permute.xlu1 %1360 }
 0x10e   : > { %v671_v51 = vpop.f32.mrf.mxu0  ;;  %v997_v52 = vpop.f32.mrf.mxu1  ;;  %v1147_v50 = vsel %vm1089_vm3, %v1080_v23, %v1115_v38  ;;  %v1050_v55 = vadd.f32 %v2936_v40, %v993_v29  ;;  %v1230_v56 = vmul.f32 0.5, %v1198_v41  ;;  %v988_v62 = vadd.f32 %v987_v14, %v661_v7 }
 0x10f   : > { %v2558_v53 = vpop.eup %2557  ;;  %v1114_v59 = vmul.f32 0.5, %v1079_v47  ;;  %v3112_v60 = vsel %vm1089_vm3, %v2550_v8, %v1231_v48  ;;  %2571 = vtanh.f32 %v1144_v45  ;;  %v1201_v3 = vadd.f32 1.0, %v3075_v22  ;;  %v3136_v32 = vpop.permute.xlu0 %1358 }
 0x110   : > { %v3106_v57 = vpop.eup %2559  ;;  %v1082_v0 = vmax.f32 %v1050_v55, 0.0  ;;  %1532 = vrot.lane.b32.xlu1 %v3112_v60, %s2661_s20  ;;  %v3118_v1 = vsel %vm1089_vm3, %v2552_v15, %v1230_v56  ;;  %2573 = vtanh.f32 %v1147_v50  ;;  %v1049_v5 = vadd.f32 %v2936_v40, %v988_v62  ;;  %v2464_v7 = vpop.f32.mrf.mxu0 }
 0x111   : > { %v1146_v4 = vsel %vm1089_vm3, %v1079_v47, %v1114_v59  ;;  %1530 = vrot.lane.b32.xlu0 %v3118_v1, %s2661_s20  ;;  %v1003_v6 = vadd.f32 %v2511_v26, %v2461_v25  ;;  %v2514_v8 = vpop.f32.mrf.mxu1  ;;  %v1233_v11 = vmul.f32 0.5, %v1201_v3  ;;  %v1200_v12 = vadd.f32 1.0, %v2556_v42  ;;  %v3159_v3 = vpop.permute.xlu1 %1364 }
 0x112   : > { %2575 = vtanh.f32 %v1146_v4  ;;  %v1117_v10 = vmul.f32 0.5, %v1082_v0  ;;  %v1081_v14 = vmax.f32 %v1049_v5, 0.0  ;;  %v998_v19 = vadd.f32 %v997_v52, %v671_v51  ;;  %v681_v45 = vpop.f32.mrf.mxu0 }
 0x113   : > { %v2562_v13 = vpop.eup %2561  ;;  %v1052_v15 = vadd.f32 %v2936_v40, %v1003_v6  ;;  %v1203_v21 = vadd.f32 1.0, %v2558_v53  ;;  %v3134_v25 = vsel %vm1089_vm3, %v3075_v22, %v1233_v11  ;;  %v1232_v26 = vmul.f32 0.5, %v1200_v12  ;;  %v1007_v47 = vpop.f32.mrf.mxu1 }
 0x114   : > { %v1149_v27 = vsel %vm1089_vm3, %v1082_v0, %v1117_v10  ;;  %v1013_v23 = vadd.f32 %v2514_v8, %v2464_v7  ;;  %v1116_v34 = vmul.f32 0.5, %v1081_v14  ;;  %1536 = vrot.lane.b32.xlu1 %v3134_v25, %s2661_s20  ;;  %v1051_v29 = vadd.f32 %v2936_v40, %v998_v19  ;;  %v3167_v12 = vpop.permute.xlu0 %1362 }
 0x115   : > { %v2564_v30 = vpop.eup %2563  ;;  %2577 = vtanh.f32 %v1149_v27  ;;  %v1084_v35 = vmax.f32 %v1052_v15, 0.0  ;;  %v3142_v38 = vsel %vm1089_vm3, %v2556_v42, %v1232_v26  ;;  %v1235_v22 = vmul.f32 0.5, %v1203_v21 }
 0x116   : > { %v2566_v37 = vpop.eup %2565  ;;  %v1054_v41 = vadd.f32 %v2936_v40, %v1013_v23  ;;  %v1148_v48 = vsel %vm1089_vm3, %v1081_v14, %v1116_v34  ;;  %1534 = vrot.lane.b32.xlu0 %v3142_v38, %s2661_s20  ;;  %v1202_v52 = vadd.f32 1.0, %v3106_v57  ;;  %v1083_v50 = vmax.f32 %v1051_v29, 0.0 }
 0x117   : > { %v1119_v51 = vmul.f32 0.5, %v1084_v35  ;;  %2579 = vtanh.f32 %v1148_v48  ;;  %v3153_v42 = vsel %vm1089_vm3, %v2558_v53, %v1235_v22  ;;  %v1008_v62 = vadd.f32 %v1007_v47, %v681_v45  ;;  %v3185_v45 = vpop.permute.xlu1 %1368 }
 0x118   : > { %v1086_v55 = vmax.f32 %v1054_v41, 0.0  ;;  %1540 = vrot.lane.b32.xlu1 %v3153_v42, %s2661_s20  ;;  %v1234_v59 = vmul.f32 0.5, %v1202_v52  ;;  %v1118_v4 = vmul.f32 0.5, %v1083_v50  ;;  %v1205_v6 = vadd.f32 1.0, %v2562_v13 }
 0x119   : > { %v1151_v56 = vsel %vm1089_vm3, %v1084_v35, %v1119_v51  ;;  %v2568_v0 = vpop.eup %2567  ;;  %v1053_v8 = vadd.f32 %v2936_v40, %v1008_v62  ;;  %v1204_v10 = vadd.f32 1.0, %v2564_v30  ;;  %v1207_v11 = vadd.f32 1.0, %v2566_v37 }
 0x11a   : > { %2581 = vtanh.f32 %v1151_v56  ;;  %v1121_v5 = vmul.f32 0.5, %v1086_v55  ;;  %v2570_v7 = vpop.eup %2569  ;;  %v3164_v53 = vsel %vm1089_vm3, %v3106_v57, %v1234_v59  ;;  %v1150_v14 = vsel %vm1089_vm3, %v1083_v50, %v1118_v4 }
 0x11b   : > { %1538 = vrot.lane.b32.xlu0 %v3164_v53, %s2661_s20  ;;  %v1237_v19 = vmul.f32 0.5, %v1205_v6  ;;  %2583 = vtanh.f32 %v1150_v14  ;;  %v1085_v57 = vmax.f32 %v1053_v8, 0.0  ;;  %v1236_v27 = vmul.f32 0.5, %v1204_v10  ;;  %v3213_v10 = vpop.permute.xlu1 %1372 }
 0x11c   : > { %v1153_v15 = vsel %vm1089_vm3, %v1086_v55, %v1121_v5  ;;  %v2572_v21 = vpop.eup %2571  ;;  %v1239_v26 = vmul.f32 0.5, %v1207_v11  ;;  %v1206_v34 = vadd.f32 1.0, %v2568_v0  ;;  %v1209_v35 = vadd.f32 1.0, %v2570_v7 }
 0x11d   : > { %v2574_v40 = vpop.eup %2573  ;;  %2585 = vtanh.f32 %v1153_v15  ;;  %v3177_v23 = vsel %vm1089_vm3, %v2562_v13, %v1237_v19  ;;  %v1120_v22 = vmul.f32 0.5, %v1085_v57  ;;  %v3183_v41 = vsel %vm1089_vm3, %v2564_v30, %v1236_v27  ;;  %v3195_v30 = vpop.permute.xlu0 %1366 }
 0x11e   : > { %1544 = vrot.lane.b32.xlu1 %v3177_v23, %s2661_s20  ;;  %v3191_v13 = vsel %vm1089_vm3, %v2566_v37, %v1239_v26  ;;  %v1238_v47 = vmul.f32 0.5, %v1206_v34  ;;  %v1241_v48 = vmul.f32 0.5, %v1209_v35  ;;  %v1208_v52 = vadd.f32 1.0, %v2572_v21 }
 0x11f   : > { %v2576_v29 = vpop.eup %2575  ;;  %1542 = vrot.lane.b32.xlu0 %v3183_v41, %s2661_s20  ;;  %v1152_v51 = vsel %vm1089_vm3, %v1085_v57, %v1120_v22  ;;  %v1211_v50 = vadd.f32 1.0, %v2574_v40  ;;  %v3231_v22 = vpop.permute.xlu1 %1376 }
 0x120   : > { %v1210_v55 = vadd.f32 1.0, %v2576_v29  ;;  %2587 = vtanh.f32 %v1152_v51  ;;  %v3199_v59 = vsel %vm1089_vm3, %v2568_v0, %v1238_v47  ;;  %v1240_v37 = vmul.f32 0.5, %v1208_v52 }
 0x121   : > { %v3207_v62 = vsel %vm1089_vm3, %v2570_v7, %v1241_v48  ;;  %v1243_v4 = vmul.f32 0.5, %v1211_v50  ;;  %v3217_v15 = vpop.permute.xlu0 %1370 }
 0x122   : > { %v2578_v56 = vpop.eup %2577  ;;  %1548 = vrot.lane.b32.xlu1 %v3191_v13, %s2661_s20  ;;  %v3211_v8 = vsel %vm1089_vm3, %v2572_v21, %v1240_v37  ;;  %v1242_v0 = vmul.f32 0.5, %v1210_v55 }
 0x123   : > { %1546 = vrot.lane.b32.xlu0 %v3199_v59, %s2661_s20  ;;  %v1213_v5 = vadd.f32 1.0, %v2578_v56  ;;  %v3223_v7 = vsel %vm1089_vm3, %v2574_v40, %v1243_v4 }
 0x124   : > { %v2580_v6 = vpop.eup %2579  ;;  %v3227_v57 = vsel %vm1089_vm3, %v2576_v29, %v1242_v0 }
 0x125   : > { %v1212_v14 = vadd.f32 1.0, %v2580_v6  ;;  %v1245_v19 = vmul.f32 0.5, %v1213_v5  ;;  %v3243_v52 = vpop.permute.xlu0 %1374  ;;  %v3257_v5 = vpop.permute.xlu1 %1380 }
 0x126   : > { %1552 = vrot.lane.b32.xlu1 %v3207_v62, %s2661_s20 }
 0x127   : > { %v2582_v11 = vpop.eup %2581  ;;  %1550 = vrot.lane.b32.xlu0 %v3211_v8, %s2661_s20  ;;  %v1244_v27 = vmul.f32 0.5, %v1212_v14  ;;  %v3237_v40 = vsel %vm1089_vm3, %v2578_v56, %v1245_v19 }
 0x128   : > { %v1215_v21 = vadd.f32 1.0, %v2582_v11  ;;  %v2584_v26 = vpop.eup %2583 }
 0x129   : > { %v1214_v35 = vadd.f32 1.0, %v2584_v26  ;;  %v3241_v29 = vsel %vm1089_vm3, %v2580_v6, %v1244_v27  ;;  %v3261_v0 = vpop.permute.xlu0 %1378  ;;  %v3275_v19 = vpop.permute.xlu1 %1384 }
 0x12a   : > { %v2586_v34 = vpop.eup %2585  ;;  %1556 = vrot.lane.b32.xlu1 %v3223_v7, %s2661_s20  ;;  %v1247_v47 = vmul.f32 0.5, %v1215_v21 }
 0x12b   : > { %1554 = vrot.lane.b32.xlu0 %v3227_v57, %s2661_s20  ;;  %v1217_v48 = vadd.f32 1.0, %v2586_v34  ;;  %v1246_v51 = vmul.f32 0.5, %v1214_v35 }
 0x12c   : > { %v3251_v55 = vsel %vm1089_vm3, %v2582_v11, %v1247_v47 }
 0x12d   : > { %v2588_v50 = vpop.eup %2587  ;;  %v1249_v56 = vmul.f32 0.5, %v1217_v48  ;;  %v3255_v4 = vsel %vm1089_vm3, %v2584_v26, %v1246_v51  ;;  %v3279_v21 = vpop.permute.xlu0 %1382 }
 0x12e   : > { %1560 = vrot.lane.b32.xlu1 %v3237_v40, %s2661_s20  ;;  %v1216_v37 = vadd.f32 1.0, %v2588_v50  ;;  %v3281_v27 = vpop.permute.xlu1 %1388 }
 0x12f   : > { %1558 = vrot.lane.b32.xlu0 %v3241_v29, %s2661_s20  ;;  %v3267_v11 = vsel %vm1089_vm3, %v2586_v34, %v1249_v56 }
 0x130   : > { %v1248_v6 = vmul.f32 0.5, %v1216_v37 }
 0x131   : > { %v3283_v26 = vpop.permute.xlu0 %1386 }
 0x132   : > { %1564 = vrot.lane.b32.xlu1 %v3251_v55, %s2661_s20  ;;  %v3271_v14 = vsel %vm1089_vm3, %v2588_v50, %v1248_v6  ;;  %3779 = vst [vmem:[#allocation2_spill] sm:$0xff] %v3283_v26  ;;  %v3285_v34 = vpop.permute.xlu1 %1392 }
 0x133   : > { %1562 = vrot.lane.b32.xlu0 %v3255_v4, %s2661_s20  ;;  %3780 = vst [vmem:[#allocation3_spill] sm:$0xff] %v3285_v34 }
 0x135   : > { %v3287_v35 = vpop.permute.xlu0 %1390 }
 0x136   : > { %1568 = vrot.lane.b32.xlu1 %v3267_v11, %s2661_s20  ;;  %3781 = vst [vmem:[#allocation4_spill] sm:$0xff] %v3287_v35  ;;  %v3289_v43 = vpop.permute.xlu1 %1396 }
 0x137   : > { %1566 = vrot.lane.b32.xlu0 %v3271_v14, %s2661_s20  ;;  %3782 = vst [vmem:[#allocation5_spill] sm:$0xff] %v3289_v43 }
 0x139   : > { %v3291_v47 = vpop.permute.xlu0 %1394 }
 0x13a   : > { %v3293_v48 = vpop.permute.xlu1 %1400 }
 0x13b   : > { %3783 = vst [vmem:[#allocation6_spill] sm:$0xff] %v3293_v48 }
 0x13d   : > { %v3295_v51 = vpop.permute.xlu0 %1398 }
 0x13e   : > { %3784 = vst [vmem:[#allocation7_spill] sm:$0xff] %v3295_v51  ;;  %v3297_v50 = vpop.permute.xlu1 %1404 }
 0x13f   : > { %3785 = vst [vmem:[#allocation8_spill] sm:$0xff] %v3297_v50 }
 0x141   : > { %v3299_v56 = vpop.permute.xlu0 %1402 }
 0x142   : > { %3786 = vst [vmem:[#allocation9_spill] sm:$0xff] %v3299_v56  ;;  %v3301_v37 = vpop.permute.xlu1 %1408 }
 0x143   : > { %3787 = vst [vmem:[#allocation10_spill] sm:$0xff] %v3301_v37 }
 0x145   : > { %v3303_v6 = vpop.permute.xlu0 %1406 }
 0x146   : > { %3788 = vst [vmem:[#allocation11_spill] sm:$0xff] %v3303_v6 }
 0x163   : > { %v1509_v26 = vpop.permute.xlu1 %1508 }
 0x164   : > { %v1603_v34 = vmul.f32 %v1509_v26, %v2974_v9 }
 0x165   : > { %v1507_v35 = vpop.permute.xlu0 %1506 }
 0x166   : > { %v1602_v43 = vmul.f32 %v1507_v35, %v2984_v16  ;;  %1668 = vrot.lane.b32.xlu1 %v1603_v34, %s2661_s20 }
 0x168   : > { %1666 = vrot.lane.b32.xlu0 %v1602_v43, %s2661_s20 }
 0x169   : > { %v1511_v48 = vpop.permute.xlu0 %1510 }
 0x16a   : > { %v1604_v51 = vmul.f32 %v1511_v48, %v2993_v33  ;;  %v1513_v50 = vpop.permute.xlu1 %1512 }
 0x16b   : > { %v1605_v37 = vmul.f32 %v1513_v50, %v3002_v49 }
 0x16c   : > { %1670 = vrot.lane.b32.xlu0 %v1604_v51, %s2661_s20 }
 0x16d   : > { %1672 = vrot.lane.b32.xlu1 %v1605_v37, %s2661_s20 }
 0x16e   : > { %v1517_v6 = vpop.permute.xlu1 %1516 }
 0x16f   : > { %v1607_v26 = vmul.f32 %v1517_v6, %v3015_v2 }
 0x171   : > { %v1515_v56 = vpop.permute.xlu0 %1514  ;;  %1676 = vrot.lane.b32.xlu1 %v1607_v26, %s2661_s20 }
 0x172   : > { %v1606_v34 = vmul.f32 %v1515_v56, %v3025_v20 }
 0x174   : > { %v1521_v35 = vpop.permute.xlu1 %1520  ;;  %1674 = vrot.lane.b32.xlu0 %v1606_v34, %s2661_s20 }
 0x175   : > { %v1609_v43 = vmul.f32 %v1521_v35, %v3038_v36  ;;  %v1519_v48 = vpop.permute.xlu0 %1518 }
 0x176   : > { %v1608_v51 = vmul.f32 %v1519_v48, %v3044_v44 }
 0x177   : > { %1680 = vrot.lane.b32.xlu1 %v1609_v43, %s2661_s20 }
 0x178   : > { %1678 = vrot.lane.b32.xlu0 %v1608_v51, %s2661_s20  ;;  %v1525_v50 = vpop.permute.xlu1 %1524 }
 0x179   : > { %v1611_v37 = vmul.f32 %v1525_v50, %v3061_v63 }
 0x17b   : > { %v1523_v6 = vpop.permute.xlu0 %1522  ;;  %1684 = vrot.lane.b32.xlu1 %v1611_v37, %s2661_s20 }
 0x17c   : > { %v1610_v56 = vmul.f32 %v1523_v6, %v3073_v18 }
 0x17d   : > { %v1529_v26 = vpop.permute.xlu1 %1528 }
 0x17e   : > { %v1613_v34 = vmul.f32 %v1529_v26, %v3084_v28  ;;  %1682 = vrot.lane.b32.xlu0 %v1610_v56, %s2661_s20 }
 0x17f   : > { %v1527_v35 = vpop.permute.xlu0 %1526 }
 0x180   : > { %v1612_v48 = vmul.f32 %v1527_v35, %v3095_v39  ;;  %1688 = vrot.lane.b32.xlu1 %v1613_v34, %s2661_s20 }
 0x182   : > { %v1533_v43 = vpop.permute.xlu1 %1532  ;;  %1686 = vrot.lane.b32.xlu0 %v1612_v48, %s2661_s20 }
 0x183   : > { %v1615_v51 = vmul.f32 %v1533_v43, %v3112_v60  ;;  %v1531_v50 = vpop.permute.xlu0 %1530 }
 0x184   : > { %v1614_v37 = vmul.f32 %v1531_v50, %v3118_v1 }
 0x185   : > { %1692 = vrot.lane.b32.xlu1 %v1615_v51, %s2661_s20 }
 0x186   : > { %1690 = vrot.lane.b32.xlu0 %v1614_v37, %s2661_s20  ;;  %v1537_v6 = vpop.permute.xlu1 %1536 }
 0x187   : > { %v1617_v56 = vmul.f32 %v1537_v6, %v3134_v25 }
 0x188   : > { %v1535_v26 = vpop.permute.xlu0 %1534 }
 0x189   : > { %v1616_v35 = vmul.f32 %v1535_v26, %v3142_v38  ;;  %1696 = vrot.lane.b32.xlu1 %v1617_v56, %s2661_s20 }
 0x18a   : > { %v1541_v34 = vpop.permute.xlu1 %1540 }
 0x18b   : > { %v1619_v48 = vmul.f32 %v1541_v34, %v3153_v42  ;;  %1694 = vrot.lane.b32.xlu0 %v1616_v35, %s2661_s20 }
 0x18d   : > { %v1539_v43 = vpop.permute.xlu0 %1538  ;;  %1700 = vrot.lane.b32.xlu1 %v1619_v48, %s2661_s20 }
 0x18e   : > { %v1618_v51 = vmul.f32 %v1539_v43, %v3164_v53 }
 0x190   : > { %v1545_v50 = vpop.permute.xlu1 %1544  ;;  %1698 = vrot.lane.b32.xlu0 %v1618_v51, %s2661_s20 }
 0x191   : > { %v1621_v37 = vmul.f32 %v1545_v50, %v3177_v23  ;;  %v1543_v6 = vpop.permute.xlu0 %1542 }
 0x192   : > { %v1620_v26 = vmul.f32 %v1543_v6, %v3183_v41 }
 0x193   : > { %1704 = vrot.lane.b32.xlu1 %v1621_v37, %s2661_s20 }
 0x194   : > { %v1549_v56 = vpop.permute.xlu1 %1548  ;;  %1702 = vrot.lane.b32.xlu0 %v1620_v26, %s2661_s20 }
 0x195   : > { %v1623_v35 = vmul.f32 %v1549_v56, %v3191_v13  ;;  %v1547_v34 = vpop.permute.xlu0 %1546 }
 0x196   : > { %v1622_v48 = vmul.f32 %v1547_v34, %v3199_v59 }
 0x197   : > { %1708 = vrot.lane.b32.xlu1 %v1623_v35, %s2661_s20 }
 0x198   : > { %v1553_v43 = vpop.permute.xlu1 %1552  ;;  %1706 = vrot.lane.b32.xlu0 %v1622_v48, %s2661_s20 }
 0x199   : > { %v1625_v51 = vmul.f32 %v1553_v43, %v3207_v62  ;;  %v1551_v50 = vpop.permute.xlu0 %1550 }
 0x19a   : > { %v1624_v6 = vmul.f32 %v1551_v50, %v3211_v8 }
 0x19b   : > { %1712 = vrot.lane.b32.xlu1 %v1625_v51, %s2661_s20 }
 0x19c   : > { %v1557_v37 = vpop.permute.xlu1 %1556  ;;  %1710 = vrot.lane.b32.xlu0 %v1624_v6, %s2661_s20 }
 0x19d   : > { %v1627_v26 = vmul.f32 %v1557_v37, %v3223_v7  ;;  %v1555_v56 = vpop.permute.xlu0 %1554 }
 0x19e   : > { %v1626_v34 = vmul.f32 %v1555_v56, %v3227_v57 }
 0x19f   : > { %1716 = vrot.lane.b32.xlu1 %v1627_v26, %s2661_s20 }
 0x1a0   : > { %v1561_v35 = vpop.permute.xlu1 %1560  ;;  %1714 = vrot.lane.b32.xlu0 %v1626_v34, %s2661_s20 }
 0x1a1   : > { %v1629_v48 = vmul.f32 %v1561_v35, %v3237_v40  ;;  %v1559_v43 = vpop.permute.xlu0 %1558 }
 0x1a2   : > { %v1628_v50 = vmul.f32 %v1559_v43, %v3241_v29 }
 0x1a3   : > { %1720 = vrot.lane.b32.xlu1 %v1629_v48, %s2661_s20  ;;  %v1443_v48 = vmul.f32 %v3086_v31, %v2974_v9  ;;  %v1445_v31 = vmul.f32 %v3069_v17, %v3002_v49 }
 0x1a4   : > { %v1565_v51 = vpop.permute.xlu1 %1564  ;;  %1718 = vrot.lane.b32.xlu0 %v1628_v50, %s2661_s20 }
 0x1a5   : > { %v1631_v6 = vmul.f32 %v1565_v51, %v3251_v55  ;;  %v1563_v37 = vpop.permute.xlu0 %1562  ;;  %v1442_v51 = vmul.f32 %v3055_v61, %v2984_v16 }
 0x1a6   : > { %v1630_v56 = vmul.f32 %v1563_v37, %v3255_v4 }
 0x1a7   : > { %1724 = vrot.lane.b32.xlu1 %v1631_v6, %s2661_s20 }
 0x1a8   : > { %v1569_v26 = vpop.permute.xlu1 %1568  ;;  %1722 = vrot.lane.b32.xlu0 %v1630_v56, %s2661_s20 }
 0x1a9   : > { %v1633_v34 = vmul.f32 %v1569_v26, %v3267_v11  ;;  %v1567_v35 = vpop.permute.xlu0 %1566  ;;  %v1444_v26 = vmul.f32 %v3046_v46, %v2993_v33 }
 0x1aa   : > { %v1632_v43 = vmul.f32 %v1567_v35, %v3271_v14 }
 0x1ab   : > { %1728 = vrot.lane.b32.xlu1 %v1633_v34, %s2661_s20 }
 0x1ac   : > { %1726 = vrot.lane.b32.xlu0 %v1632_v43, %s2661_s20 }
 0x1d8   : > { %v1669_v50 = vpop.permute.xlu1 %1668 }
 0x1d9   : > { %v3373_v6 = vadd.f32 %v1669_v50, %v1443_v48  ;;  %v1447_v48 = vmul.f32 %v3101_v54, %v3015_v2  ;;  %v1449_v54 = vmul.f32 %v3127_v24, %v3038_v36 }
 0x1da   : > { %v1667_v37 = vpop.permute.xlu0 %1666 }
 0x1db   : > { %2589 = vtanh.f32 %v3373_v6  ;;  %v3376_v56 = vadd.f32 %v1667_v37, %v1442_v51  ;;  %v1446_v51 = vmul.f32 %v3108_v58, %v3025_v20 }
 0x1dd   : > { %2591 = vtanh.f32 %v3376_v56 }
 0x1de   : > { %v1671_v34 = vpop.permute.xlu0 %1670 }
 0x1df   : > { %v3381_v35 = vadd.f32 %v1671_v34, %v1444_v26  ;;  %v1673_v43 = vpop.permute.xlu1 %1672 }
 0x1e0   : > { %v3386_v61 = vadd.f32 %v1673_v43, %v1445_v31  ;;  %v1448_v31 = vmul.f32 %v3136_v32, %v3044_v44 }
 0x1e1   : > { %2593 = vtanh.f32 %v3381_v35 }
 0x1e2   : > { %2595 = vtanh.f32 %v3386_v61 }
 0x1e3   : > { %v1677_v50 = vpop.permute.xlu1 %1676 }
 0x1e4   : > { %v3391_v46 = vadd.f32 %v1677_v50, %v1447_v48 }
 0x1e6   : > { %2597 = vtanh.f32 %v3391_v46  ;;  %v1675_v17 = vpop.permute.xlu0 %1674 }
 0x1e7   : > { %v3396_v26 = vadd.f32 %v1675_v17, %v1446_v51 }
 0x1e8   : > { %v2590_v37 = vpop.eup %2589 }
 0x1e9   : > { %1860 = vrot.lane.b32.xlu1 %v2590_v37, %s2661_s20  ;;  %2599 = vtanh.f32 %v3396_v26  ;;  %v1681_v43 = vpop.permute.xlu1 %1680  ;;  %v1451_v37 = vmul.f32 %v3159_v3, %v3061_v63 }
 0x1ea   : > { %v2592_v34 = vpop.eup %2591  ;;  %v3405_v58 = vadd.f32 %v1681_v43, %v1449_v54  ;;  %v1679_v48 = vpop.permute.xlu0 %1678 }
 0x1eb   : > { %1858 = vrot.lane.b32.xlu0 %v2592_v34, %s2661_s20  ;;  %v3407_v50 = vadd.f32 %v1679_v48, %v1448_v31  ;;  %v1450_v34 = vmul.f32 %v3167_v12, %v3073_v18  ;;  %v1453_v31 = vmul.f32 %v3185_v45, %v3084_v28  ;;  %v1455_v45 = vmul.f32 %v3213_v10, %v3112_v60 }
 0x1ec   : > { %2601 = vtanh.f32 %v3405_v58  ;;  %v1457_v10 = vmul.f32 %v3231_v22, %v3134_v25 }
 0x1ed   : > { %2603 = vtanh.f32 %v3407_v50  ;;  %v1685_v24 = vpop.permute.xlu1 %1684 }
 0x1ee   : > { %v2594_v51 = vpop.eup %2593  ;;  %v3414_v17 = vadd.f32 %v1685_v24, %v1451_v37 }
 0x1ef   : > { %1862 = vrot.lane.b32.xlu0 %v2594_v51, %s2661_s20  ;;  %v2596_v32 = vpop.eup %2595  ;;  %v1452_v51 = vmul.f32 %v3195_v30, %v3095_v39  ;;  %v1454_v30 = vmul.f32 %v3217_v15, %v3118_v1 }
 0x1f0   : > { %1864 = vrot.lane.b32.xlu1 %v2596_v32, %s2661_s20  ;;  %2605 = vtanh.f32 %v3414_v17  ;;  %v1683_v54 = vpop.permute.xlu0 %1682 }
 0x1f1   : > { %v3422_v3 = vadd.f32 %v1683_v54, %v1450_v34 }
 0x1f2   : > { %v1689_v48 = vpop.permute.xlu1 %1688 }
 0x1f3   : > { %3789 = vst [vmem:[#allocation12_spill] sm:$0xff] %v3422_v3  ;;  %v2598_v43 = vpop.eup %2597  ;;  %2607 = vtanh.f32 %v3422_v3  ;;  %v3427_v37 = vadd.f32 %v1689_v48, %v1453_v31 }
 0x1f4   : > { %1868 = vrot.lane.b32.xlu1 %v2598_v43, %s2661_s20  ;;  %v1687_v12 = vpop.permute.xlu0 %1686 }
 0x1f5   : > { %2609 = vtanh.f32 %v3427_v37  ;;  %v3431_v32 = vadd.f32 %v1687_v12, %v1452_v51  ;;  %v1456_v12 = vmul.f32 %v3243_v52, %v3142_v38 }
 0x1f6   : > { %v2600_v24 = vpop.eup %2599 }
 0x1f7   : > { %1866 = vrot.lane.b32.xlu0 %v2600_v24, %s2661_s20  ;;  %2611 = vtanh.f32 %v3431_v32  ;;  %v1693_v34 = vpop.permute.xlu1 %1692 }
 0x1f8   : > { %v3439_v31 = vadd.f32 %v1693_v34, %v1455_v45  ;;  %v1691_v43 = vpop.permute.xlu0 %1690 }
 0x1f9   : > { %v2602_v54 = vpop.eup %2601  ;;  %v3441_v3 = vadd.f32 %v1691_v43, %v1454_v30  ;;  %v1459_v30 = vmul.f32 %v3257_v5, %v3153_v42 }
 0x1fa   : > { %v2604_v48 = vpop.eup %2603  ;;  %1872 = vrot.lane.b32.xlu1 %v2602_v54, %s2661_s20  ;;  %2613 = vtanh.f32 %v3439_v31 }
 0x1fb   : > { %1870 = vrot.lane.b32.xlu0 %v2604_v48, %s2661_s20  ;;  %2615 = vtanh.f32 %v3441_v3  ;;  %v1697_v15 = vpop.permute.xlu1 %1696  ;;  %v1458_v48 = vmul.f32 %v3261_v0, %v3164_v53 }
 0x1fc   : > { %v3451_v24 = vadd.f32 %v1697_v15, %v1457_v10 }
 0x1fd   : > { %v2606_v51 = vpop.eup %2605  ;;  %v1695_v45 = vpop.permute.xlu0 %1694 }
 0x1fe   : > { %1876 = vrot.lane.b32.xlu1 %v2606_v51, %s2661_s20  ;;  %2617 = vtanh.f32 %v3451_v24  ;;  %v3457_v34 = vadd.f32 %v1695_v45, %v1456_v12  ;;  %v1461_v51 = vmul.f32 %v3275_v19, %v3177_v23  ;;  %v1460_v12 = vmul.f32 %v3279_v21, %v3183_v41  ;;  %v3791_v21 = vld [vmem:[#allocation2_spill] sm:$0xff] }
 0x1ff   : > { %v1701_v54 = vpop.permute.xlu1 %1700  ;;  %v1463_v19 = vmul.f32 %v3281_v27, %v3191_v13 }
 0x200   : > { %v2608_v22 = vpop.eup %2607  ;;  %2619 = vtanh.f32 %v3457_v34  ;;  %v3460_v43 = vadd.f32 %v1701_v54, %v1459_v30 }
 0x201   : > { %1874 = vrot.lane.b32.xlu0 %v2608_v22, %s2661_s20 }
 0x202   : > { %v2610_v52 = vpop.eup %2609  ;;  %2621 = vtanh.f32 %v3460_v43  ;;  %v1699_v10 = vpop.permute.xlu0 %1698 }
 0x203   : > { %1880 = vrot.lane.b32.xlu1 %v2610_v52, %s2661_s20  ;;  %v3467_v15 = vadd.f32 %v1699_v10, %v1458_v48  ;;  %v1462_v48 = vmul.f32 %v3791_v21, %v3199_v59 }
 0x204   : > { %v2612_v5 = vpop.eup %2611 }
 0x205   : > { %1878 = vrot.lane.b32.xlu0 %v2612_v5, %s2661_s20  ;;  %2623 = vtanh.f32 %v3467_v15  ;;  %v1705_v45 = vpop.permute.xlu1 %1704 }
 0x206   : > { %v3475_v30 = vadd.f32 %v1705_v45, %v1461_v51  ;;  %v1703_v22 = vpop.permute.xlu0 %1702 }
 0x207   : > { %v2614_v0 = vpop.eup %2613  ;;  %v3477_v52 = vadd.f32 %v1703_v22, %v1460_v12 }
 0x208   : > { %v2616_v54 = vpop.eup %2615  ;;  %1884 = vrot.lane.b32.xlu1 %v2614_v0, %s2661_s20  ;;  %2625 = vtanh.f32 %v3475_v30  ;;  %v3794_v0 = vld [vmem:[#allocation3_spill] sm:$0xff] }
 0x209   : > { %3790 = vst [vmem:[#allocation13_spill] sm:$0xff] %v3477_v52  ;;  %1882 = vrot.lane.b32.xlu0 %v2616_v54, %s2661_s20  ;;  %2627 = vtanh.f32 %v3477_v52  ;;  %v1709_v10 = vpop.permute.xlu1 %1708  ;;  %v1465_v22 = vmul.f32 %v3794_v0, %v3207_v62  ;;  %v3795_v54 = vld [vmem:[#allocation4_spill] sm:$0xff]  ;;  %v3798_v0 = vld [vmem:[#allocation5_spill] sm:$0xff] }
 0x20a   : > { %v3487_v5 = vadd.f32 %v1709_v10, %v1463_v19  ;;  %v1707_v51 = vpop.permute.xlu0 %1706  ;;  %v1464_v21 = vmul.f32 %v3795_v54, %v3211_v8 }
 0x20b   : > { %v2618_v12 = vpop.eup %2617  ;;  %v3489_v45 = vadd.f32 %v1707_v51, %v1462_v48 }
 0x20c   : > { %3792 = vst [vmem:[#allocation2_spill] sm:$0xff] %v3487_v5  ;;  %2629 = vtanh.f32 %v3487_v5  ;;  %1888 = vrot.lane.b32.xlu1 %v2618_v12, %s2661_s20  ;;  %v1467_v5 = vmul.f32 %v3798_v0, %v3223_v7  ;;  %v1466_v12 = vmul.f32 %v3291_v47, %v3227_v57  ;;  %v3802_v0 = vld [vmem:[#allocation7_spill] sm:$0xff] }
 0x20d   : > { %3793 = vst [vmem:[#allocation14_spill] sm:$0xff] %v3489_v45  ;;  %v2620_v27 = vpop.eup %2619  ;;  %2631 = vtanh.f32 %v3489_v45  ;;  %v1713_v52 = vpop.permute.xlu1 %1712  ;;  %v1468_v47 = vmul.f32 %v3802_v0, %v3241_v29  ;;  %v3806_v0 = vld [vmem:[#allocation9_spill] sm:$0xff] }
 0x20e   : > { %v3498_v19 = vadd.f32 %v1713_v52, %v1465_v22  ;;  %v1711_v10 = vpop.permute.xlu0 %1710  ;;  %1886 = vrot.lane.b32.xlu0 %v2620_v27, %s2661_s20 }
 0x20f   : > { %v2622_v48 = vpop.eup %2621  ;;  %v3501_v51 = vadd.f32 %v1711_v10, %v1464_v21  ;;  %v3801_v21 = vld [vmem:[#allocation6_spill] sm:$0xff] }
 0x210   : > { %3796 = vst [vmem:[#allocation3_spill] sm:$0xff] %v3498_v19  ;;  %2633 = vtanh.f32 %v3498_v19  ;;  %1892 = vrot.lane.b32.xlu1 %v2622_v48, %s2661_s20  ;;  %v1469_v10 = vmul.f32 %v3801_v21, %v3237_v40 }
 0x211   : > { %3797 = vst [vmem:[#allocation4_spill] sm:$0xff] %v3501_v51  ;;  %2635 = vtanh.f32 %v3501_v51  ;;  %v1717_v52 = vpop.permute.xlu1 %1716 }
 0x212   : > { %v2624_v22 = vpop.eup %2623  ;;  %v3510_v54 = vadd.f32 %v1717_v52, %v1467_v5  ;;  %v1715_v27 = vpop.permute.xlu0 %1714 }
 0x213   : > { %v3512_v45 = vadd.f32 %v1715_v27, %v1466_v12  ;;  %1890 = vrot.lane.b32.xlu0 %v2624_v22, %s2661_s20  ;;  %v3805_v22 = vld [vmem:[#allocation8_spill] sm:$0xff] }
 0x214   : > { %3799 = vst [vmem:[#allocation5_spill] sm:$0xff] %v3510_v54  ;;  %2637 = vtanh.f32 %v3510_v54  ;;  %v1471_v27 = vmul.f32 %v3805_v22, %v3251_v55 }
 0x215   : > { %3800 = vst [vmem:[#allocation15_spill] sm:$0xff] %v3512_v45  ;;  %v2626_v48 = vpop.eup %2625  ;;  %2639 = vtanh.f32 %v3512_v45  ;;  %v1721_v51 = vpop.permute.xlu1 %1720  ;;  %v1470_v45 = vmul.f32 %v3806_v0, %v3255_v4  ;;  %v3808_v0 = vld [vmem:[#allocation11_spill] sm:$0xff] }
 0x216   : > { %v2628_v19 = vpop.eup %2627  ;;  %v3521_v5 = vadd.f32 %v1721_v51, %v1469_v10  ;;  %1896 = vrot.lane.b32.xlu1 %v2626_v48, %s2661_s20  ;;  %v1719_v12 = vpop.permute.xlu0 %1718 }
 0x217   : > { %v3524_v52 = vadd.f32 %v1719_v12, %v1468_v47  ;;  %1894 = vrot.lane.b32.xlu0 %v2628_v19, %s2661_s20  ;;  %v3807_v19 = vld [vmem:[#allocation10_spill] sm:$0xff] }
 0x218   : > { %3803 = vst [vmem:[#allocation6_spill] sm:$0xff] %v3521_v5  ;;  %2641 = vtanh.f32 %v3521_v5  ;;  %v1473_v12 = vmul.f32 %v3807_v19, %v3267_v11 }
 0x219   : > { %3804 = vst [vmem:[#allocation7_spill] sm:$0xff] %v3524_v52  ;;  %v2630_v21 = vpop.eup %2629  ;;  %2643 = vtanh.f32 %v3524_v52  ;;  %v1725_v51 = vpop.permute.xlu1 %1724  ;;  %v1472_v52 = vmul.f32 %v3808_v0, %v3271_v14 }
 0x21a   : > { %v2632_v10 = vpop.eup %2631  ;;  %v3533_v54 = vadd.f32 %v1725_v51, %v1471_v27  ;;  %1900 = vrot.lane.b32.xlu1 %v2630_v21, %s2661_s20  ;;  %v1723_v48 = vpop.permute.xlu0 %1722 }
 0x21b   : > { %v3536_v47 = vadd.f32 %v1723_v48, %v1470_v45  ;;  %1898 = vrot.lane.b32.xlu0 %v2632_v10, %s2661_s20 }
 0x21c   : > { %2645 = vtanh.f32 %v3533_v54 }
 0x21d   : > { %v2634_v22 = vpop.eup %2633  ;;  %2647 = vtanh.f32 %v3536_v47  ;;  %v1729_v27 = vpop.permute.xlu1 %1728 }
 0x21e   : > { %v2636_v51 = vpop.eup %2635  ;;  %v3545_v5 = vadd.f32 %v1729_v27, %v1473_v12  ;;  %1904 = vrot.lane.b32.xlu1 %v2634_v22, %s2661_s20  ;;  %v1727_v45 = vpop.permute.xlu0 %1726 }
 0x21f   : > { %v3548_v21 = vadd.f32 %v1727_v45, %v1472_v52  ;;  %1902 = vrot.lane.b32.xlu0 %v2636_v51, %s2661_s20 }
 0x220   : > { %2649 = vtanh.f32 %v3545_v5 }
 0x221   : > { %v2638_v10 = vpop.eup %2637  ;;  %2651 = vtanh.f32 %v3548_v21 }
 0x222   : > { %v2640_v48 = vpop.eup %2639  ;;  %1908 = vrot.lane.b32.xlu1 %v2638_v10, %s2661_s20 }
 0x223   : > { %1906 = vrot.lane.b32.xlu0 %v2640_v48, %s2661_s20 }
 0x225   : > { %v2642_v19 = vpop.eup %2641 }
 0x226   : > { %v2644_v12 = vpop.eup %2643  ;;  %1912 = vrot.lane.b32.xlu1 %v2642_v19, %s2661_s20 }
 0x227   : > { %1910 = vrot.lane.b32.xlu0 %v2644_v12, %s2661_s20 }
 0x229   : > { %v2646_v52 = vpop.eup %2645 }
 0x22a   : > { %v2648_v22 = vpop.eup %2647  ;;  %1916 = vrot.lane.b32.xlu1 %v2646_v52, %s2661_s20 }
 0x22b   : > { %1914 = vrot.lane.b32.xlu0 %v2648_v22, %s2661_s20 }
 0x22d   : > { %v2650_v0 = vpop.eup %2649 }
 0x22e   : > { %v2652_v27 = vpop.eup %2651  ;;  %1920 = vrot.lane.b32.xlu1 %v2650_v0, %s2661_s20 }
 0x22f   : > { %1918 = vrot.lane.b32.xlu0 %v2652_v27, %s2661_s20 }
 0x25b   : > { %v1861_v51 = vpop.permute.xlu1 %1860 }
 0x25c   : > { %v1955_v45 = vmul.f32 %v1861_v51, %v2974_v9 }
 0x25d   : > { %v1859_v10 = vpop.permute.xlu0 %1858 }
 0x25e   : > { %v1954_v48 = vmul.f32 %v1859_v10, %v2984_v16  ;;  %2020 = vrot.lane.b32.xlu1 %v1955_v45, %s2662_s24 }
 0x260   : > { %2018 = vrot.lane.b32.xlu0 %v1954_v48, %s2662_s24 }
 0x261   : > { %v1863_v19 = vpop.permute.xlu0 %1862 }
 0x262   : > { %v1956_v12 = vmul.f32 %v1863_v19, %v2993_v33  ;;  %v1865_v52 = vpop.permute.xlu1 %1864 }
 0x263   : > { %v1957_v22 = vmul.f32 %v1865_v52, %v3002_v49 }
 0x264   : > { %2022 = vrot.lane.b32.xlu0 %v1956_v12, %s2662_s24 }
 0x265   : > { %2024 = vrot.lane.b32.xlu1 %v1957_v22, %s2662_s24 }
 0x266   : > { %v1869_v0 = vpop.permute.xlu1 %1868 }
 0x267   : > { %v1959_v9 = vmul.f32 %v1869_v0, %v3015_v2 }
 0x269   : > { %v1867_v27 = vpop.permute.xlu0 %1866  ;;  %2028 = vrot.lane.b32.xlu1 %v1959_v9, %s2662_s24 }
 0x26a   : > { %v1958_v16 = vmul.f32 %v1867_v27, %v3025_v20 }
 0x26c   : > { %v1873_v51 = vpop.permute.xlu1 %1872  ;;  %2026 = vrot.lane.b32.xlu0 %v1958_v16, %s2662_s24 }
 0x26d   : > { %v1961_v33 = vmul.f32 %v1873_v51, %v3038_v36  ;;  %v1871_v45 = vpop.permute.xlu0 %1870 }
 0x26e   : > { %v1960_v10 = vmul.f32 %v1871_v45, %v3044_v44 }
 0x26f   : > { %2032 = vrot.lane.b32.xlu1 %v1961_v33, %s2662_s24 }
 0x270   : > { %2030 = vrot.lane.b32.xlu0 %v1960_v10, %s2662_s24  ;;  %v1877_v49 = vpop.permute.xlu1 %1876 }
 0x271   : > { %v1963_v2 = vmul.f32 %v1877_v49, %v3061_v63 }
 0x273   : > { %v1875_v48 = vpop.permute.xlu0 %1874  ;;  %2036 = vrot.lane.b32.xlu1 %v1963_v2, %s2662_s24 }
 0x274   : > { %v1962_v20 = vmul.f32 %v1875_v48, %v3073_v18 }
 0x275   : > { %v1881_v19 = vpop.permute.xlu1 %1880 }
 0x276   : > { %v1965_v12 = vmul.f32 %v1881_v19, %v3084_v28  ;;  %2034 = vrot.lane.b32.xlu0 %v1962_v20, %s2662_s24 }
 0x277   : > { %v1879_v36 = vpop.permute.xlu0 %1878 }
 0x278   : > { %v1964_v44 = vmul.f32 %v1879_v36, %v3095_v39  ;;  %2040 = vrot.lane.b32.xlu1 %v1965_v12, %s2662_s24 }
 0x27a   : > { %v1885_v52 = vpop.permute.xlu1 %1884  ;;  %2038 = vrot.lane.b32.xlu0 %v1964_v44, %s2662_s24 }
 0x27b   : > { %v1967_v63 = vmul.f32 %v1885_v52, %v3112_v60  ;;  %v1883_v22 = vpop.permute.xlu0 %1882 }
 0x27c   : > { %v1966_v0 = vmul.f32 %v1883_v22, %v3118_v1 }
 0x27d   : > { %2044 = vrot.lane.b32.xlu1 %v1967_v63, %s2662_s24 }
 0x27e   : > { %2042 = vrot.lane.b32.xlu0 %v1966_v0, %s2662_s24  ;;  %v1889_v18 = vpop.permute.xlu1 %1888 }
 0x27f   : > { %v1969_v28 = vmul.f32 %v1889_v18, %v3134_v25 }
 0x280   : > { %v1887_v9 = vpop.permute.xlu0 %1886 }
 0x281   : > { %v1968_v39 = vmul.f32 %v1887_v9, %v3142_v38  ;;  %2048 = vrot.lane.b32.xlu1 %v1969_v28, %s2662_s24 }
 0x282   : > { %v1893_v27 = vpop.permute.xlu1 %1892 }
 0x283   : > { %v1971_v16 = vmul.f32 %v1893_v27, %v3153_v42  ;;  %2046 = vrot.lane.b32.xlu0 %v1968_v39, %s2662_s24 }
 0x285   : > { %v1891_v60 = vpop.permute.xlu0 %1890  ;;  %2052 = vrot.lane.b32.xlu1 %v1971_v16, %s2662_s24 }
 0x286   : > { %v1970_v1 = vmul.f32 %v1891_v60, %v3164_v53 }
 0x288   : > { %v1897_v51 = vpop.permute.xlu1 %1896  ;;  %2050 = vrot.lane.b32.xlu0 %v1970_v1, %s2662_s24  ;;  %v3809_v1 = vld [vmem:[#allocation12_spill] sm:$0xff] }
 0x289   : > { %v1973_v25 = vmul.f32 %v1897_v51, %v3177_v23  ;;  %v1895_v33 = vpop.permute.xlu0 %1894 }
 0x28a   : > { %v1972_v38 = vmul.f32 %v1895_v33, %v3183_v41 }
 0x28b   : > { %2056 = vrot.lane.b32.xlu1 %v1973_v25, %s2662_s24 }
 0x28c   : > { %v1901_v45 = vpop.permute.xlu1 %1900  ;;  %2054 = vrot.lane.b32.xlu0 %v1972_v38, %s2662_s24 }
 0x28d   : > { %v1975_v42 = vmul.f32 %v1901_v45, %v3191_v13  ;;  %v1899_v10 = vpop.permute.xlu0 %1898 }
 0x28e   : > { %v1974_v49 = vmul.f32 %v1899_v10, %v3199_v59 }
 0x28f   : > { %2060 = vrot.lane.b32.xlu1 %v1975_v42, %s2662_s24 }
 0x290   : > { %v1905_v53 = vpop.permute.xlu1 %1904  ;;  %2058 = vrot.lane.b32.xlu0 %v1974_v49, %s2662_s24 }
 0x291   : > { %v1977_v23 = vmul.f32 %v1905_v53, %v3207_v62  ;;  %v1903_v2 = vpop.permute.xlu0 %1902 }
 0x292   : > { %v1976_v41 = vmul.f32 %v1903_v2, %v3211_v8 }
 0x293   : > { %2064 = vrot.lane.b32.xlu1 %v1977_v23, %s2662_s24 }
 0x294   : > { %v1909_v48 = vpop.permute.xlu1 %1908  ;;  %2062 = vrot.lane.b32.xlu0 %v1976_v41, %s2662_s24  ;;  %v3810_v41 = vld [vmem:[#allocation13_spill] sm:$0xff] }
 0x295   : > { %v1979_v13 = vmul.f32 %v1909_v48, %v3223_v7  ;;  %v1907_v20 = vpop.permute.xlu0 %1906 }
 0x296   : > { %v1978_v59 = vmul.f32 %v1907_v20, %v3227_v57 }
 0x297   : > { %2068 = vrot.lane.b32.xlu1 %v1979_v13, %s2662_s24  ;;  %v3811_v13 = vld [vmem:[#allocation2_spill] sm:$0xff] }
 0x298   : > { %v1913_v19 = vpop.permute.xlu1 %1912  ;;  %2066 = vrot.lane.b32.xlu0 %v1978_v59, %s2662_s24  ;;  %v3812_v59 = vld [vmem:[#allocation14_spill] sm:$0xff] }
 0x299   : > { %v1981_v62 = vmul.f32 %v1913_v19, %v3237_v40  ;;  %v1911_v12 = vpop.permute.xlu0 %1910 }
 0x29a   : > { %v1980_v8 = vmul.f32 %v1911_v12, %v3241_v29 }
 0x29b   : > { %2072 = vrot.lane.b32.xlu1 %v1981_v62, %s2662_s24  ;;  %v3813_v62 = vld [vmem:[#allocation3_spill] sm:$0xff] }
 0x29c   : > { %v1917_v36 = vpop.permute.xlu1 %1916  ;;  %2070 = vrot.lane.b32.xlu0 %v1980_v8, %s2662_s24 }
 0x29d   : > { %v1983_v7 = vmul.f32 %v1917_v36, %v3251_v55  ;;  %v1915_v44 = vpop.permute.xlu0 %1914  ;;  %v3814_v36 = vld [vmem:[#allocation4_spill] sm:$0xff] }
 0x29e   : > { %v1982_v57 = vmul.f32 %v1915_v44, %v3255_v4 }
 0x29f   : > { %2076 = vrot.lane.b32.xlu1 %v1983_v7, %s2662_s24 }
 0x2a0   : > { %v1921_v52 = vpop.permute.xlu1 %1920  ;;  %2074 = vrot.lane.b32.xlu0 %v1982_v57, %s2662_s24  ;;  %v3815_v57 = vld [vmem:[#allocation5_spill] sm:$0xff] }
 0x2a1   : > { %v1985_v40 = vmul.f32 %v1921_v52, %v3267_v11  ;;  %v1919_v63 = vpop.permute.xlu0 %1918 }
 0x2a2   : > { %v1984_v29 = vmul.f32 %v1919_v63, %v3271_v14  ;;  %v3816_v63 = vld [vmem:[#allocation15_spill] sm:$0xff] }
 0x2a3   : > { %2080 = vrot.lane.b32.xlu1 %v1985_v40, %s2662_s24 }
 0x2a4   : > { %2078 = vrot.lane.b32.xlu0 %v1984_v29, %s2662_s24 }
 0x2d0   : > { %v2021_v55 = vpop.permute.xlu1 %2020 }
 0x2d1   : > { %v2115_v4 = vsel %vm368_vm1, %v2021_v55, %v3373_v6 }
 0x2d2   : > { %2148 = vst.msk [vmem:[%s3629_s27 + $0x8] sm:$0xff] %vm2146_vm4, %v2115_v4  ;;  %v2019_v11 = vpop.permute.xlu0 %2018  ;;  %v3817_v4 = vld [vmem:[#allocation6_spill] sm:$0xff] }
 0x2d3   : > { %v2114_v14 = vsel %vm368_vm1, %v2019_v11, %v3376_v56 }
 0x2d4   : > { %2147 = vst.msk [vmem:[%s3629_s27] sm:$0xff] %vm2146_vm4, %v2114_v14 }
 0x2d6   : > { %v2023_v22 = vpop.permute.xlu0 %2022 }
 0x2d7   : > { %v2116_v0 = vsel %vm368_vm1, %v2023_v22, %v3381_v35  ;;  %v2025_v18 = vpop.permute.xlu1 %2024  ;;  %v3818_v22 = vld [vmem:[#allocation7_spill] sm:$0xff] }
 0x2d8   : > { %2149 = vst.msk [vmem:[%s3629_s27 + $0x10] sm:$0xff] %vm2146_vm4, %v2116_v0  ;;  %v2117_v6 = vsel %vm368_vm1, %v2025_v18, %v3386_v61 }
 0x2d9   : > { %2150 = vst.msk [vmem:[%s3629_s27 + $0x18] sm:$0xff] %vm2146_vm4, %v2117_v6 }
 0x2db   : > { %v2029_v28 = vpop.permute.xlu1 %2028 }
 0x2dc   : > { %v2119_v56 = vsel %vm368_vm1, %v2029_v28, %v3391_v46 }
 0x2dd   : > { %2152 = vst.msk [vmem:[%s3629_s27 + $0x28] sm:$0xff] %vm2146_vm4, %v2119_v56 }
 0x2de   : > { %v2027_v9 = vpop.permute.xlu0 %2026 }
 0x2df   : > { %v2118_v35 = vsel %vm368_vm1, %v2027_v9, %v3396_v26 }
 0x2e0   : > { %2151 = vst.msk [vmem:[%s3629_s27 + $0x20] sm:$0xff] %vm2146_vm4, %v2118_v35 }
 0x2e1   : > { %v2033_v39 = vpop.permute.xlu1 %2032 }
 0x2e2   : > { %v2121_v61 = vsel %vm368_vm1, %v2033_v39, %v3405_v58  ;;  %v2031_v27 = vpop.permute.xlu0 %2030 }
 0x2e3   : > { %2154 = vst.msk [vmem:[%s3629_s27 + $0x38] sm:$0xff] %vm2146_vm4, %v2121_v61  ;;  %v2120_v46 = vsel %vm368_vm1, %v2031_v27, %v3407_v50 }
 0x2e4   : > { %2153 = vst.msk [vmem:[%s3629_s27 + $0x30] sm:$0xff] %vm2146_vm4, %v2120_v46 }
 0x2e5   : > { %v2037_v16 = vpop.permute.xlu1 %2036 }
 0x2e6   : > { %v2123_v26 = vsel %vm368_vm1, %v2037_v16, %v3414_v17 }
 0x2e7   : > { %2156 = vst.msk [vmem:[%s3629_s27 + $0x48] sm:$0xff] %vm2146_vm4, %v2123_v26 }
 0x2e8   : > { %v2035_v60 = vpop.permute.xlu0 %2034 }
 0x2e9   : > { %v2122_v58 = vsel %vm368_vm1, %v2035_v60, %v3809_v1 }
 0x2ea   : > { %2155 = vst.msk [vmem:[%s3629_s27 + $0x40] sm:$0xff] %vm2146_vm4, %v2122_v58  ;;  %v2041_v51 = vpop.permute.xlu1 %2040 }
 0x2eb   : > { %v2125_v50 = vsel %vm368_vm1, %v2041_v51, %v3427_v37 }
 0x2ec   : > { %2158 = vst.msk [vmem:[%s3629_s27 + $0x58] sm:$0xff] %vm2146_vm4, %v2125_v50  ;;  %v2039_v25 = vpop.permute.xlu0 %2038 }
 0x2ed   : > { %v2124_v17 = vsel %vm368_vm1, %v2039_v25, %v3431_v32 }
 0x2ee   : > { %2157 = vst.msk [vmem:[%s3629_s27 + $0x50] sm:$0xff] %vm2146_vm4, %v2124_v17 }
 0x2ef   : > { %v2045_v33 = vpop.permute.xlu1 %2044 }
 0x2f0   : > { %v2127_v38 = vsel %vm368_vm1, %v2045_v33, %v3439_v31  ;;  %v2043_v45 = vpop.permute.xlu0 %2042 }
 0x2f1   : > { %2160 = vst.msk [vmem:[%s3629_s27 + $0x68] sm:$0xff] %vm2146_vm4, %v2127_v38  ;;  %v2126_v37 = vsel %vm368_vm1, %v2043_v45, %v3441_v3 }
 0x2f2   : > { %2159 = vst.msk [vmem:[%s3629_s27 + $0x60] sm:$0xff] %vm2146_vm4, %v2126_v37 }
 0x2f3   : > { %v2049_v42 = vpop.permute.xlu1 %2048 }
 0x2f4   : > { %v2129_v32 = vsel %vm368_vm1, %v2049_v42, %v3451_v24 }
 0x2f5   : > { %2162 = vst.msk [vmem:[%s3629_s27 + $0x78] sm:$0xff] %vm2146_vm4, %v2129_v32  ;;  %v2047_v10 = vpop.permute.xlu0 %2046 }
 0x2f6   : > { %v2128_v31 = vsel %vm368_vm1, %v2047_v10, %v3457_v34 }
 0x2f7   : > { %2161 = vst.msk [vmem:[%s3629_s27 + $0x70] sm:$0xff] %vm2146_vm4, %v2128_v31  ;;  %v2053_v49 = vpop.permute.xlu1 %2052 }
 0x2f8   : > { %v2131_v3 = vsel %vm368_vm1, %v2053_v49, %v3460_v43 }
 0x2f9   : > { %2164 = vst.msk [vmem:[%s3629_s27 + $0x88] sm:$0xff] %vm2146_vm4, %v2131_v3 }
 0x2fa   : > { %v2051_v53 = vpop.permute.xlu0 %2050 }
 0x2fb   : > { %v2130_v24 = vsel %vm368_vm1, %v2051_v53, %v3467_v15 }
 0x2fc   : > { %2163 = vst.msk [vmem:[%s3629_s27 + $0x80] sm:$0xff] %vm2146_vm4, %v2130_v24 }
 0x2fd   : > { %v2057_v23 = vpop.permute.xlu1 %2056 }
 0x2fe   : > { %v2133_v34 = vsel %vm368_vm1, %v2057_v23, %v3475_v30  ;;  %v2055_v2 = vpop.permute.xlu0 %2054 }
 0x2ff   : > { %2166 = vst.msk [vmem:[%s3629_s27 + $0x98] sm:$0xff] %vm2146_vm4, %v2133_v34  ;;  %v2132_v43 = vsel %vm368_vm1, %v2055_v2, %v3810_v41 }
 0x300   : > { %2165 = vst.msk [vmem:[%s3629_s27 + $0x90] sm:$0xff] %vm2146_vm4, %v2132_v43 }
 0x301   : > { %v2061_v48 = vpop.permute.xlu1 %2060 }
 0x302   : > { %v2135_v15 = vsel %vm368_vm1, %v2061_v48, %v3811_v13  ;;  %v2059_v20 = vpop.permute.xlu0 %2058 }
 0x303   : > { %2168 = vst.msk [vmem:[%s3629_s27 + $0xa8] sm:$0xff] %vm2146_vm4, %v2135_v15  ;;  %v2134_v30 = vsel %vm368_vm1, %v2059_v20, %v3812_v59 }
 0x304   : > { %2167 = vst.msk [vmem:[%s3629_s27 + $0xa0] sm:$0xff] %vm2146_vm4, %v2134_v30 }
 0x305   : > { %v2065_v19 = vpop.permute.xlu1 %2064 }
 0x306   : > { %v2137_v12 = vsel %vm368_vm1, %v2065_v19, %v3813_v62  ;;  %v2063_v8 = vpop.permute.xlu0 %2062 }
 0x307   : > { %2170 = vst.msk [vmem:[%s3629_s27 + $0xb8] sm:$0xff] %vm2146_vm4, %v2137_v12  ;;  %v2136_v7 = vsel %vm368_vm1, %v2063_v8, %v3814_v36 }
 0x308   : > { %2169 = vst.msk [vmem:[%s3629_s27 + $0xb0] sm:$0xff] %vm2146_vm4, %v2136_v7 }
 0x309   : > { %v2069_v44 = vpop.permute.xlu1 %2068 }
 0x30a   : > { %v2139_v52 = vsel %vm368_vm1, %v2069_v44, %v3815_v57  ;;  %v2067_v40 = vpop.permute.xlu0 %2066 }
 0x30b   : > { %2172 = vst.msk [vmem:[%s3629_s27 + $0xc8] sm:$0xff] %vm2146_vm4, %v2139_v52  ;;  %v2138_v29 = vsel %vm368_vm1, %v2067_v40, %v3816_v63 }
 0x30c   : > { %2171 = vst.msk [vmem:[%s3629_s27 + $0xc0] sm:$0xff] %vm2146_vm4, %v2138_v29 }
 0x30d   : > { %v2073_v55 = vpop.permute.xlu1 %2072 }
 0x30e   : > { %v2141_v11 = vsel %vm368_vm1, %v2073_v55, %v3817_v4  ;;  %v2071_v14 = vpop.permute.xlu0 %2070 }
 0x30f   : > { %2174 = vst.msk [vmem:[%s3629_s27 + $0xd8] sm:$0xff] %vm2146_vm4, %v2141_v11  ;;  %v2140_v0 = vsel %vm368_vm1, %v2071_v14, %v3818_v22 }
 0x310   : > { %2173 = vst.msk [vmem:[%s3629_s27 + $0xd0] sm:$0xff] %vm2146_vm4, %v2140_v0 }
 0x311   : > { %v2077_v18 = vpop.permute.xlu1 %2076 }
 0x312   : > { %v2143_v6 = vsel %vm368_vm1, %v2077_v18, %v3533_v54  ;;  %v2075_v28 = vpop.permute.xlu0 %2074 }
 0x313   : > { %2176 = vst.msk [vmem:[%s3629_s27 + $0xe8] sm:$0xff] %vm2146_vm4, %v2143_v6  ;;  %v2142_v56 = vsel %vm368_vm1, %v2075_v28, %v3536_v47 }
 0x314   : > { %2175 = vst.msk [vmem:[%s3629_s27 + $0xe0] sm:$0xff] %vm2146_vm4, %v2142_v56 }
 0x315   : > { %v2081_v9 = vpop.permute.xlu1 %2080 }
 0x316   : > { %v2145_v35 = vsel %vm368_vm1, %v2081_v9, %v3545_v5  ;;  %v2079_v39 = vpop.permute.xlu0 %2078 }
 0x317   : > { %2178 = vst.msk [vmem:[%s3629_s27 + $0xf8] sm:$0xff] %vm2146_vm4, %v2145_v35  ;;  %v2144_v61 = vsel %vm368_vm1, %v2079_v39, %v3548_v21 }
 0x318   : > { %2177 = vst.msk [vmem:[%s3629_s27 + $0xf0] sm:$0xff] %vm2146_vm4, %v2144_v61 }
 0x319 PF: > { %s16_s21 = sadd.s32 1, %s2659_s21  }
 0x31a   : > { %p13_p4 = scmp.ge.s32.totalorder %s16_s21, 4  }
 0x31c   :  { %15 = sbr.rel (!%p13_p4) target bundleno = 1 (0x1), region = 80 }

</bundles_post_ra>
